<compile_context>
chip_gen: v6e
topology: v6e:2x2x1
jax: 0.10.0
libtpu: 0.0.40
codegen_flags: <defaults>
</compile_context>

<pallas_src>
import math
from functools import partial

import jax
import jax.numpy as jnp
from jax import lax
from jax.experimental import pallas as pl
from jax.experimental.pallas import tpu as pltpu


def _round_up(x, m):
    return ((x + m - 1) // m) * m


def _gelu_tanh(h):
    # tanh-approximate GELU: the transcendental lands on the (otherwise idle)
    # EUP slot and the surrounding polynomial is ~3x fewer VALU ops than the
    # erf expansion.  Max deviation from exact erf-GELU ~1e-3 (inside kernel
    # tolerance).  TODO(synk): on v6e/v7x this can additionally run in bf16
    # (bf16 VALU) for another ~2x VALU throughput.
    c0 = 0.7978845608028654   # sqrt(2/pi)
    c1 = 0.044715
    return 0.5 * h * (1.0 + jnp.tanh(c0 * (h + c1 * h * h * h)))


def _encoder_block_kernel(x_ref, ln1_g, ln1_b, wqkv_t, bqkv, wo_t, bo,
                          ln2_g, ln2_b, w1_t, b1, w2_t, b2, o_ref,
                          *, num_heads, seq_len, mlp_chunk):
    f32 = jnp.float32
    bf16 = jnp.bfloat16
    Bt, S_pad, E = x_ref.shape
    nh = num_heads
    d = E // nh
    H = w1_t.shape[1]
    rows = Bt * S_pad
    eps = 1e-5

    # (Bt, S_pad, E) -> (Bt*S_pad, E): dense projections and the MLP see one
    # tall row block (amortizes per-step overhead, fills the MXU M dimension).
    x = x_ref[...].reshape(rows, E)

    # ---- LayerNorm 1 (f32, biased variance, eps=1e-5) ----
    mu = jnp.mean(x, axis=-1, keepdims=True)
    var = jnp.mean((x - mu) * (x - mu), axis=-1, keepdims=True)
    xn = (x - mu) * lax.rsqrt(var + eps) * ln1_g[0] + ln1_b[0]

    # ---- QKV projection: bf16 MXU inputs, f32 accumulation.  wqkv_t is
    # pre-transposed (E, 3E) with 1/sqrt(d) folded into the q columns. ----
    qkv = jnp.dot(xn.astype(bf16), wqkv_t[...],
                  preferred_element_type=f32) + bqkv[0]          # (rows, 3E) f32
    # Cast BEFORE the head relayouts: halves the bytes moved by the
    # reshape/transpose plumbing below.
    qkv = qkv.astype(bf16)

    def to_heads(t):                       # (rows, E) -> (Bt*nh, S_pad, d)
        t = t.reshape(Bt, S_pad, nh, d)
        return jnp.transpose(t, (0, 2, 1, 3)).reshape(Bt * nh, S_pad, d)

    qh = to_heads(qkv[:, 0 * E:1 * E])
    kh = to_heads(qkv[:, 1 * E:2 * E])
    vh = to_heads(qkv[:, 2 * E:3 * E])

    # ---- Attention scores + softmax (scale already folded into q) ----
    s = jnp.einsum('hqd,hkd->hqk', qh, kh,
                   preferred_element_type=f32)                   # (Bt*nh, S, S)
    if S_pad != seq_len:
        # Mask padded key positions so they get zero attention weight.
        key_mask = lax.broadcasted_iota(jnp.int32, (1, 1, S_pad), 2) < seq_len
        s = jnp.where(key_mask, s, -1e30)
    s = s - jnp.max(s, axis=-1, keepdims=True)
    p = jnp.exp(s)
    inv = pl.reciprocal(jnp.sum(p, axis=-1, keepdims=True), approx=True)

    # PV with *unnormalized* probabilities; normalize afterwards on the
    # (Bt*nh, S, d) result (~S/d fewer multiplies than scaling p itself).
    o = jnp.einsum('hqk,hkd->hqd', p.astype(bf16), vh,
                   preferred_element_type=f32)
    o = (o * inv).astype(bf16)            # cast before the relayout back
    attn = jnp.transpose(o.reshape(Bt, nh, S_pad, d),
                         (0, 2, 1, 3)).reshape(rows, E)
    attn = jnp.dot(attn, wo_t[...], preferred_element_type=f32) + bo[0]

    x1 = x + attn                                                # residual 1

    # ---- LayerNorm 2 ----
    mu2 = jnp.mean(x1, axis=-1, keepdims=True)
    var2 = jnp.mean((x1 - mu2) * (x1 - mu2), axis=-1, keepdims=True)
    xn2 = ((x1 - mu2) * lax.rsqrt(var2 + eps) * ln2_g[0]
           + ln2_b[0]).astype(bf16)

    # ---- MLP: hidden dim processed in static chunks so the (rows, H) f32
    # intermediate never materializes whole (bounds VMEM on v7x / 64 MiB). ----
    n_chunks = H // mlp_chunk
    y = jnp.zeros((rows, E), f32)
    for c in range(n_chunks):
        lo, hi = c * mlp_chunk, (c + 1) * mlp_chunk
        h = jnp.dot(xn2, w1_t[:, lo:hi],
                    preferred_element_type=f32) + b1[0, lo:hi]
        h = _gelu_tanh(h)
        y = y + jnp.dot(h.astype(bf16), w2_t[lo:hi, :],
                        preferred_element_type=f32)
    y = y + b2[0]

    o_ref[...] = (x1 + y).reshape(Bt, S_pad, E)                  # residual 2


def pack_params(params, *, num_heads):
    """Pre-transpose / pre-scale / bf16-cast the block weights ONCE (at model
    init) so nothing is recomputed per forward call or per layer."""
    E = params["wo"].shape[0]
    d = E // num_heads
    scale = 1.0 / math.sqrt(d)
    col_scale = jnp.concatenate([jnp.full((E,), scale, jnp.float32),
                                 jnp.ones((2 * E,), jnp.float32)])
    bf16 = jnp.bfloat16

    def row(p):   # (N,) -> (1, N) f32 so every bias/LN param ref is 2-D
        return jnp.asarray(p, jnp.float32).reshape(1, -1)

    return {
        "ln1_g": row(params["ln1_g"]), "ln1_b": row(params["ln1_b"]),
        "wqkv_t": (params["wqkv"].T * col_scale[None, :]).astype(bf16),  # (E,3E)
        "bqkv": row(params["bqkv"] * col_scale),
        "wo_t": params["wo"].T.astype(bf16),                             # (E,E)
        "bo": row(params["bo"]),
        "ln2_g": row(params["ln2_g"]), "ln2_b": row(params["ln2_b"]),
        "w1_t": params["w1"].T.astype(bf16),                             # (E,H)
        "b1": row(params["b1"]),
        "w2_t": params["w2"].T.astype(bf16),                             # (H,E)
        "b2": row(params["b2"]),
    }


def _vmem_bytes_estimate(Bt, S_pad, E, H, Hc, nh):
    f32b, b16b = 4, 2
    rows = Bt * S_pad
    weights = (3 * E * E + E * E + E * H + H * E) * b16b \
        + (3 * E + 6 * E + H) * f32b                          # + biases / LN
    io = 2 * 2 * Bt * S_pad * E * f32b                        # x + out, 2-buffered
    inter = (rows * 3 * E * (f32b + b16b)                     # qkv f32 + bf16
             + 3 * rows * E * b16b                            # qh/kh/vh
             + Bt * nh * S_pad * S_pad * (2 * f32b + b16b)    # s, p, p_bf16
             + 4 * rows * E * f32b                            # attn/x1/xn2/y
             + rows * Hc * (f32b + 2 * b16b))                 # mlp chunk
    return weights + io + int(1.5 * inter) + (2 << 20)


def attention_block(x_bse, packed, *, num_heads, images_per_step=4,
                    mlp_chunk=1024, seq_pad_multiple=16):
    """ViT encoder block.  x_bse: (B, S, E) float32, batch-first (HF layout).
    `packed` comes from pack_params() (pre-transposed bf16 weights)."""
    B, S, E = x_bse.shape
    H = packed["w1_t"].shape[1]

    Bt = max(1, min(images_per_step, B))
    B_pad = _round_up(B, Bt)
    # Pad S for bf16 sublane packing (x16).  At ViT scale (S=197) consider
    # padding further (208/256) for fully lane-dense softmax stores.
    S_pad = _round_up(S, seq_pad_multiple)
    x = x_bse
    if S_pad != S or B_pad != B:
        x = jnp.pad(x, ((0, B_pad - B), (0, S_pad - S), (0, 0)))

    Hc = mlp_chunk if (H % mlp_chunk == 0) else H
    Hc = min(Hc, H)

    kern = partial(_encoder_block_kernel, num_heads=num_heads,
                   seq_len=S, mlp_chunk=Hc)

    def const_spec(shape):
        # Grid-invariant weights: constant index map + single-buffered so they
        # are DMA'd once per pallas_call and not double-buffered in VMEM.
        return pl.BlockSpec(shape, lambda g: tuple(0 for _ in shape),
                            pipeline_mode=pl.Buffered(1))

    # VMEM budget derived from actual buffer sizes, capped by the part's
    # physical VMEM (64 MiB on v7x, 128 MiB on v5e/v6e) minus headroom.
    est = _vmem_bytes_estimate(Bt, S_pad, E, H, Hc, num_heads)
    try:
        cap = getattr(pltpu.get_tpu_info(), "vmem_capacity_bytes", None)
        cap = (cap - (16 << 20)) if cap else (48 << 20)
    except Exception:
        cap = 48 << 20
    vmem_limit = int(min(max(2 * est, 32 << 20), max(cap, 32 << 20)))

    grid = (B_pad // Bt,)
    out = pl.pallas_call(
        kern,
        out_shape=jax.ShapeDtypeStruct((B_pad, S_pad, E), jnp.float32),
        grid_spec=pltpu.PrefetchScalarGridSpec(
            num_scalar_prefetch=0,
            grid=grid,
            in_specs=[
                pl.BlockSpec((Bt, S_pad, E), lambda g: (g, 0, 0)),   # x
                const_spec((1, E)), const_spec((1, E)),              # ln1 g/b
                const_spec((E, 3 * E)), const_spec((1, 3 * E)),      # qkv W^T, b
                const_spec((E, E)), const_spec((1, E)),              # out W^T, b
                const_spec((1, E)), const_spec((1, E)),              # ln2 g/b
                const_spec((E, H)), const_spec((1, H)),              # mlp W1^T, b1
                const_spec((H, E)), const_spec((1, E)),              # mlp W2^T, b2
            ],
            out_specs=pl.BlockSpec((Bt, S_pad, E), lambda g: (g, 0, 0)),
        ),
        compiler_params=pltpu.CompilerParams(
            dimension_semantics=("parallel",),
            vmem_limit_bytes=vmem_limit),
    )(
        x,
        packed["ln1_g"], packed["ln1_b"],
        packed["wqkv_t"], packed["bqkv"],
        packed["wo_t"], packed["bo"],
        packed["ln2_g"], packed["ln2_b"],
        packed["w1_t"], packed["b1"],
        packed["w2_t"], packed["b2"],
    )
    if S_pad != S or B_pad != B:
        out = out[:B, :S, :]
    return out


def attention_block_ref(x, params, *, num_heads):
    """Pure-JAX f32 reference mirroring the PyTorch module (eval mode)."""
    B, S, E = x.shape
    d = E // num_heads
    eps = 1e-5

    def ln(v, g, b):
        mu = jnp.mean(v, -1, keepdims=True)
        var = jnp.mean((v - mu) ** 2, -1, keepdims=True)
        return (v - mu) / jnp.sqrt(var + eps) * g + b

    xn = ln(x, params["ln1_g"], params["ln1_b"])
    qkv = jnp.einsum("bse,fe->bsf", xn, params["wqkv"]) + params["bqkv"]
    q, k, v = jnp.split(qkv, 3, axis=-1)
    q = q.reshape(B, S, num_heads, d).transpose(0, 2, 1, 3) / math.sqrt(d)
    k = k.reshape(B, S, num_heads, d).transpose(0, 2, 1, 3)
    v = v.reshape(B, S, num_heads, d).transpose(0, 2, 1, 3)
    p = jax.nn.softmax(jnp.einsum("bhqd,bhkd->bhqk", q, k), axis=-1)
    o = jnp.einsum("bhqk,bhkd->bhqd", p, v).transpose(0, 2, 1, 3).reshape(B, S, E)
    o = jnp.einsum("bse,fe->bsf", o, params["wo"]) + params["bo"]
    x1 = x + o
    xn2 = ln(x1, params["ln2_g"], params["ln2_b"])
    h = jnp.einsum("bse,he->bsh", xn2, params["w1"]) + params["b1"]
    h = 0.5 * h * (1.0 + lax.erf(h / math.sqrt(2.0)))
    y = jnp.einsum("bsh,eh->bse", h, params["w2"]) + params["b2"]
    return x1 + y


def init_params(key, embed_dim, hidden_dim):
    ks = jax.random.split(key, 6)
    s = 0.05
    return {
        "ln1_g": jnp.ones((embed_dim,), jnp.float32),
        "ln1_b": jnp.zeros((embed_dim,), jnp.float32),
        "wqkv": s * jax.random.normal(ks[0], (3 * embed_dim, embed_dim), jnp.float32),
        "bqkv": s * jax.random.normal(ks[1], (3 * embed_dim,), jnp.float32),
        "wo":   s * jax.random.normal(ks[2], (embed_dim, embed_dim), jnp.float32),
        "bo":   s * jax.random.normal(ks[3], (embed_dim,), jnp.float32),
        "ln2_g": jnp.ones((embed_dim,), jnp.float32),
        "ln2_b": jnp.zeros((embed_dim,), jnp.float32),
        "w1": s * jax.random.normal(ks[4], (hidden_dim, embed_dim), jnp.float32),
        "b1": jnp.zeros((hidden_dim,), jnp.float32),
        "w2": s * jax.random.normal(ks[5], (embed_dim, hidden_dim), jnp.float32),
        "b2": jnp.zeros((embed_dim,), jnp.float32),
    }


if __name__ == "__main__":
    # Small shapes consistent with the module: batch=2, seq=8, embed=32,
    # hidden=64, heads=4.  Batch-first layout (B, S, E).
    B, S, E, H, NH = 2, 8, 32, 64, 4
    key = jax.random.PRNGKey(0)
    kx, kp = jax.random.split(key)
    x = jax.random.normal(kx, (B, S, E), jnp.float32)
    params = init_params(kp, E, H)

    packed = pack_params(params, num_heads=NH)   # once, at "model init"
    out = attention_block(x, packed, num_heads=NH, images_per_step=2)
    out = jax.block_until_ready(out)

    ref = attention_block_ref(x, params, num_heads=NH)
    assert out.shape == (B, S, E)
    # bf16 MXU inputs + approx reciprocal + tanh-GELU -> relaxed tolerance
    # vs the f32/erf reference.
    assert jnp.allclose(out, ref, atol=2e-2, rtol=2e-2), \
        float(jnp.max(jnp.abs(out - ref)))
    print("KERNEL_OK")
</pallas_src>

<mosaic_0001>
module attributes {stable_mosaic.version = 11 : i64} {
  func.func @_encoder_block_kernel(%arg0: i32, %arg1: memref<2x16x32xf32, #tpu.memory_space<vmem>>, %arg2: memref<1x32xf32, #tpu.memory_space<vmem>>, %arg3: memref<1x32xf32, #tpu.memory_space<vmem>>, %arg4: memref<32x96xbf16, #tpu.memory_space<vmem>>, %arg5: memref<1x96xf32, #tpu.memory_space<vmem>>, %arg6: memref<32x32xbf16, #tpu.memory_space<vmem>>, %arg7: memref<1x32xf32, #tpu.memory_space<vmem>>, %arg8: memref<1x32xf32, #tpu.memory_space<vmem>>, %arg9: memref<1x32xf32, #tpu.memory_space<vmem>>, %arg10: memref<32x64xbf16, #tpu.memory_space<vmem>>, %arg11: memref<1x64xf32, #tpu.memory_space<vmem>>, %arg12: memref<64x32xbf16, #tpu.memory_space<vmem>>, %arg13: memref<1x32xf32, #tpu.memory_space<vmem>>, %arg14: memref<2x16x32xf32, #tpu.memory_space<vmem>>) attributes {dimension_semantics = [#tpu.dimension_semantics<parallel>], iteration_bounds = array<i64: 1>, scalar_prefetch = 0 : i64, scratch_operands = 0 : i64, tpu.core_type = #tpu.core_type<tc>, window_params = [{transform_indices = @transform_0, window_bounds = array<i64: 2, 16, 32>}, {pipeline_mode = #tpu.pipeline_mode<synchronous>, transform_indices = @transform_1, window_bounds = array<i64: 1, 32>}, {pipeline_mode = #tpu.pipeline_mode<synchronous>, transform_indices = @transform_2, window_bounds = array<i64: 1, 32>}, {pipeline_mode = #tpu.pipeline_mode<synchronous>, transform_indices = @transform_3, window_bounds = array<i64: 32, 96>}, {pipeline_mode = #tpu.pipeline_mode<synchronous>, transform_indices = @transform_4, window_bounds = array<i64: 1, 96>}, {pipeline_mode = #tpu.pipeline_mode<synchronous>, transform_indices = @transform_5, window_bounds = array<i64: 32, 32>}, {pipeline_mode = #tpu.pipeline_mode<synchronous>, transform_indices = @transform_6, window_bounds = array<i64: 1, 32>}, {pipeline_mode = #tpu.pipeline_mode<synchronous>, transform_indices = @transform_7, window_bounds = array<i64: 1, 32>}, {pipeline_mode = #tpu.pipeline_mode<synchronous>, transform_indices = @transform_8, window_bounds = array<i64: 1, 32>}, {pipeline_mode = #tpu.pipeline_mode<synchronous>, transform_indices = @transform_9, window_bounds = array<i64: 32, 64>}, {pipeline_mode = #tpu.pipeline_mode<synchronous>, transform_indices = @transform_10, window_bounds = array<i64: 1, 64>}, {pipeline_mode = #tpu.pipeline_mode<synchronous>, transform_indices = @transform_11, window_bounds = array<i64: 64, 32>}, {pipeline_mode = #tpu.pipeline_mode<synchronous>, transform_indices = @transform_12, window_bounds = array<i64: 1, 32>}, {transform_indices = @transform_13, window_bounds = array<i64: 2, 16, 32>}]} {
    %c0 = arith.constant 0 : index
    %c0_0 = arith.constant 0 : index
    %c0_1 = arith.constant 0 : index
    %0 = vector.load %arg1[%c0, %c0_0, %c0_1] : memref<2x16x32xf32, #tpu.memory_space<vmem>>, vector<2x16x32xf32>
    %1 = vector.shape_cast %0 : vector<2x16x32xf32> to vector<32x32xf32>
    %cst = arith.constant dense<0.000000e+00> : vector<32xf32>
    %2 = vector.multi_reduction <add>, %1, %cst [1] : vector<32x32xf32> to vector<32xf32>
    %3 = vector.shape_cast %2 : vector<32xf32> to vector<32x1xf32>
    %cst_2 = arith.constant 3.200000e+01 : f32
    %4 = vector.broadcast %cst_2 : f32 to vector<32x1xf32>
    %5 = arith.divf %3, %4 : vector<32x1xf32>
    %6 = vector.broadcast %5 : vector<32x1xf32> to vector<32x32xf32>
    %7 = arith.subf %1, %6 : vector<32x32xf32>
    %8 = vector.broadcast %5 : vector<32x1xf32> to vector<32x32xf32>
    %9 = arith.subf %1, %8 : vector<32x32xf32>
    %10 = arith.mulf %7, %9 : vector<32x32xf32>
    %cst_3 = arith.constant dense<0.000000e+00> : vector<32xf32>
    %11 = vector.multi_reduction <add>, %10, %cst_3 [1] : vector<32x32xf32> to vector<32xf32>
    %12 = vector.shape_cast %11 : vector<32xf32> to vector<32x1xf32>
    %cst_4 = arith.constant 3.200000e+01 : f32
    %13 = vector.broadcast %cst_4 : f32 to vector<32x1xf32>
    %14 = arith.divf %12, %13 : vector<32x1xf32>
    %15 = vector.broadcast %5 : vector<32x1xf32> to vector<32x32xf32>
    %16 = arith.subf %1, %15 : vector<32x32xf32>
    %cst_5 = arith.constant 9.99999974E-6 : f32
    %17 = vector.broadcast %cst_5 : f32 to vector<32x1xf32>
    %18 = arith.addf %14, %17 : vector<32x1xf32>
    %19 = math.rsqrt %18 : vector<32x1xf32>
    %20 = vector.broadcast %19 : vector<32x1xf32> to vector<32x32xf32>
    %21 = arith.mulf %16, %20 : vector<32x32xf32>
    %c0_6 = arith.constant 0 : index
    %c0_7 = arith.constant 0 : index
    %22 = vector.load %arg2[%c0_6, %c0_7] : memref<1x32xf32, #tpu.memory_space<vmem>>, vector<1x32xf32>
    %23 = vector.shape_cast %22 : vector<1x32xf32> to vector<32xf32>
    %24 = vector.shape_cast %23 : vector<32xf32> to vector<1x32xf32>
    %25 = vector.broadcast %24 : vector<1x32xf32> to vector<32x32xf32>
    %26 = arith.mulf %21, %25 : vector<32x32xf32>
    %c0_8 = arith.constant 0 : index
    %c0_9 = arith.constant 0 : index
    %27 = vector.load %arg3[%c0_8, %c0_9] : memref<1x32xf32, #tpu.memory_space<vmem>>, vector<1x32xf32>
    %28 = vector.shape_cast %27 : vector<1x32xf32> to vector<32xf32>
    %29 = vector.shape_cast %28 : vector<32xf32> to vector<1x32xf32>
    %30 = vector.broadcast %29 : vector<1x32xf32> to vector<32x32xf32>
    %31 = arith.addf %26, %30 : vector<32x32xf32>
    %32 = arith.truncf %31 : vector<32x32xf32> to vector<32x32xbf16>
    %c0_10 = arith.constant 0 : index
    %c0_11 = arith.constant 0 : index
    %33 = vector.load %arg4[%c0_10, %c0_11] : memref<32x96xbf16, #tpu.memory_space<vmem>>, vector<32x96xbf16>
    %cst_12 = arith.constant dense<0.000000e+00> : vector<32x96xf32>
    %34 = tpu.matmul %32, %33, %cst_12 {dimension_numbers = #tpu.dot_dimension_numbers<[1], [0], [0], [1], [0, 0, 1, 1], [], []>} : vector<32x32xbf16>, vector<32x96xbf16>, vector<32x96xf32> -> vector<32x96xf32>
    %c0_13 = arith.constant 0 : index
    %c0_14 = arith.constant 0 : index
    %35 = vector.load %arg5[%c0_13, %c0_14] : memref<1x96xf32, #tpu.memory_space<vmem>>, vector<1x96xf32>
    %36 = vector.shape_cast %35 : vector<1x96xf32> to vector<96xf32>
    %37 = vector.shape_cast %36 : vector<96xf32> to vector<1x96xf32>
    %38 = vector.broadcast %37 : vector<1x96xf32> to vector<32x96xf32>
    %39 = arith.addf %34, %38 : vector<32x96xf32>
    %40 = arith.truncf %39 : vector<32x96xf32> to vector<32x96xbf16>
    %41 = vector.extract_strided_slice %40 {offsets = [0, 0], sizes = [32, 32], strides = [1, 1]} : vector<32x96xbf16> to vector<32x32xbf16>
    %42 = vector.shape_cast %41 : vector<32x32xbf16> to vector<2x16x4x8xbf16>
    %43 = tpu.transpose %42, [0, 2, 1, 3] : vector<2x16x4x8xbf16> -> vector<2x4x16x8xbf16>
    %44 = vector.shape_cast %43 : vector<2x4x16x8xbf16> to vector<8x16x8xbf16>
    %45 = vector.extract_strided_slice %40 {offsets = [0, 32], sizes = [32, 32], strides = [1, 1]} : vector<32x96xbf16> to vector<32x32xbf16>
    %46 = vector.shape_cast %45 : vector<32x32xbf16> to vector<2x16x4x8xbf16>
    %47 = tpu.transpose %46, [0, 2, 1, 3] : vector<2x16x4x8xbf16> -> vector<2x4x16x8xbf16>
    %48 = vector.shape_cast %47 : vector<2x4x16x8xbf16> to vector<8x16x8xbf16>
    %49 = vector.extract_strided_slice %40 {offsets = [0, 64], sizes = [32, 32], strides = [1, 1]} : vector<32x96xbf16> to vector<32x32xbf16>
    %50 = vector.shape_cast %49 : vector<32x32xbf16> to vector<2x16x4x8xbf16>
    %51 = tpu.transpose %50, [0, 2, 1, 3] : vector<2x16x4x8xbf16> -> vector<2x4x16x8xbf16>
    %52 = vector.shape_cast %51 : vector<2x4x16x8xbf16> to vector<8x16x8xbf16>
    "tpu.trace_start"() <{level = 10 : i32, message = "hqd,hkd->hqk"}> : () -> ()
    %cst_15 = arith.constant dense<0.000000e+00> : vector<8x16x16xf32>
    %53 = tpu.matmul %44, %48, %cst_15 {dimension_numbers = #tpu.dot_dimension_numbers<[2], [2], [1], [1], [0, 0, 0, 1, 1, 1], [0], [0]>} : vector<8x16x8xbf16>, vector<8x16x8xbf16>, vector<8x16x16xf32> -> vector<8x16x16xf32>
    "tpu.trace_stop"() : () -> ()
    %54 = tpu.iota {dimensions = array<i32: 2>} : vector<1x1x16xi32>
    %c8_i32 = arith.constant 8 : i32
    %55 = vector.broadcast %c8_i32 : i32 to vector<1x1x16xi32>
    %56 = arith.cmpi slt, %54, %55 : vector<1x1x16xi32>
    %cst_16 = arith.constant -1.000000e+30 : f32
    %57 = vector.shape_cast %56 : vector<1x1x16xi1> to vector<1x1x16xi1>
    %58 = vector.broadcast %57 : vector<1x1x16xi1> to vector<8x16x16xi1>
    %59 = vector.broadcast %cst_16 : f32 to vector<8x16x16xf32>
    %60 = arith.select %58, %53, %59 : vector<8x16x16xi1>, vector<8x16x16xf32>
    %cst_17 = arith.constant dense<0xFF800000> : vector<8x16xf32>
    %61 = vector.multi_reduction <maximumf>, %60, %cst_17 [2] : vector<8x16x16xf32> to vector<8x16xf32>
    %62 = vector.shape_cast %61 : vector<8x16xf32> to vector<8x16x1xf32>
    %63 = vector.broadcast %62 : vector<8x16x1xf32> to vector<8x16x16xf32>
    %64 = arith.subf %60, %63 : vector<8x16x16xf32>
    %65 = math.exp %64 : vector<8x16x16xf32>
    %cst_18 = arith.constant dense<0.000000e+00> : vector<8x16xf32>
    %66 = vector.multi_reduction <add>, %65, %cst_18 [2] : vector<8x16x16xf32> to vector<8x16xf32>
    %67 = vector.shape_cast %66 : vector<8x16xf32> to vector<8x16x1xf32>
    %68 = tpu.reciprocal %67 {approx = true} : vector<8x16x1xf32> -> vector<8x16x1xf32>
    %69 = arith.truncf %65 : vector<8x16x16xf32> to vector<8x16x16xbf16>
    "tpu.trace_start"() <{level = 10 : i32, message = "hqk,hkd->hqd"}> : () -> ()
    %cst_19 = arith.constant dense<0.000000e+00> : vector<8x16x8xf32>
    %70 = tpu.matmul %69, %52, %cst_19 {dimension_numbers = #tpu.dot_dimension_numbers<[2], [1], [1], [2], [0, 0, 0, 1, 1, 2], [0], [0]>} : vector<8x16x16xbf16>, vector<8x16x8xbf16>, vector<8x16x8xf32> -> vector<8x16x8xf32>
    "tpu.trace_stop"() : () -> ()
    %71 = vector.broadcast %68 : vector<8x16x1xf32> to vector<8x16x8xf32>
    %72 = arith.mulf %70, %71 : vector<8x16x8xf32>
    %73 = arith.truncf %72 : vector<8x16x8xf32> to vector<8x16x8xbf16>
    %74 = vector.shape_cast %73 : vector<8x16x8xbf16> to vector<2x4x16x8xbf16>
    %75 = tpu.transpose %74, [0, 2, 1, 3] : vector<2x4x16x8xbf16> -> vector<2x16x4x8xbf16>
    %76 = vector.shape_cast %75 : vector<2x16x4x8xbf16> to vector<32x32xbf16>
    %c0_20 = arith.constant 0 : index
    %c0_21 = arith.constant 0 : index
    %77 = vector.load %arg6[%c0_20, %c0_21] : memref<32x32xbf16, #tpu.memory_space<vmem>>, vector<32x32xbf16>
    %cst_22 = arith.constant dense<0.000000e+00> : vector<32x32xf32>
    %78 = tpu.matmul %76, %77, %cst_22 {dimension_numbers = #tpu.dot_dimension_numbers<[1], [0], [0], [1], [0, 0, 1, 1], [], []>} : vector<32x32xbf16>, vector<32x32xbf16>, vector<32x32xf32> -> vector<32x32xf32>
    %c0_23 = arith.constant 0 : index
    %c0_24 = arith.constant 0 : index
    %79 = vector.load %arg7[%c0_23, %c0_24] : memref<1x32xf32, #tpu.memory_space<vmem>>, vector<1x32xf32>
    %80 = vector.shape_cast %79 : vector<1x32xf32> to vector<32xf32>
    %81 = vector.shape_cast %80 : vector<32xf32> to vector<1x32xf32>
    %82 = vector.broadcast %81 : vector<1x32xf32> to vector<32x32xf32>
    %83 = arith.addf %78, %82 : vector<32x32xf32>
    %84 = arith.addf %1, %83 : vector<32x32xf32>
    %cst_25 = arith.constant dense<0.000000e+00> : vector<32xf32>
    %85 = vector.multi_reduction <add>, %84, %cst_25 [1] : vector<32x32xf32> to vector<32xf32>
    %86 = vector.shape_cast %85 : vector<32xf32> to vector<32x1xf32>
    %cst_26 = arith.constant 3.200000e+01 : f32
    %87 = vector.broadcast %cst_26 : f32 to vector<32x1xf32>
    %88 = arith.divf %86, %87 : vector<32x1xf32>
    %89 = vector.broadcast %88 : vector<32x1xf32> to vector<32x32xf32>
    %90 = arith.subf %84, %89 : vector<32x32xf32>
    %91 = vector.broadcast %88 : vector<32x1xf32> to vector<32x32xf32>
    %92 = arith.subf %84, %91 : vector<32x32xf32>
    %93 = arith.mulf %90, %92 : vector<32x32xf32>
    %cst_27 = arith.constant dense<0.000000e+00> : vector<32xf32>
    %94 = vector.multi_reduction <add>, %93, %cst_27 [1] : vector<32x32xf32> to vector<32xf32>
    %95 = vector.shape_cast %94 : vector<32xf32> to vector<32x1xf32>
    %cst_28 = arith.constant 3.200000e+01 : f32
    %96 = vector.broadcast %cst_28 : f32 to vector<32x1xf32>
    %97 = arith.divf %95, %96 : vector<32x1xf32>
    %98 = vector.broadcast %88 : vector<32x1xf32> to vector<32x32xf32>
    %99 = arith.subf %84, %98 : vector<32x32xf32>
    %cst_29 = arith.constant 9.99999974E-6 : f32
    %100 = vector.broadcast %cst_29 : f32 to vector<32x1xf32>
    %101 = arith.addf %97, %100 : vector<32x1xf32>
    %102 = math.rsqrt %101 : vector<32x1xf32>
    %103 = vector.broadcast %102 : vector<32x1xf32> to vector<32x32xf32>
    %104 = arith.mulf %99, %103 : vector<32x32xf32>
    %c0_30 = arith.constant 0 : index
    %c0_31 = arith.constant 0 : index
    %105 = vector.load %arg8[%c0_30, %c0_31] : memref<1x32xf32, #tpu.memory_space<vmem>>, vector<1x32xf32>
    %106 = vector.shape_cast %105 : vector<1x32xf32> to vector<32xf32>
    %107 = vector.shape_cast %106 : vector<32xf32> to vector<1x32xf32>
    %108 = vector.broadcast %107 : vector<1x32xf32> to vector<32x32xf32>
    %109 = arith.mulf %104, %108 : vector<32x32xf32>
    %c0_32 = arith.constant 0 : index
    %c0_33 = arith.constant 0 : index
    %110 = vector.load %arg9[%c0_32, %c0_33] : memref<1x32xf32, #tpu.memory_space<vmem>>, vector<1x32xf32>
    %111 = vector.shape_cast %110 : vector<1x32xf32> to vector<32xf32>
    %112 = vector.shape_cast %111 : vector<32xf32> to vector<1x32xf32>
    %113 = vector.broadcast %112 : vector<1x32xf32> to vector<32x32xf32>
    %114 = arith.addf %109, %113 : vector<32x32xf32>
    %115 = arith.truncf %114 : vector<32x32xf32> to vector<32x32xbf16>
    %cst_34 = arith.constant 0.000000e+00 : f32
    %116 = vector.broadcast %cst_34 : f32 to vector<32x32xf32>
    %c0_35 = arith.constant 0 : index
    %c0_36 = arith.constant 0 : index
    %117 = vector.load %arg10[%c0_35, %c0_36] : memref<32x64xbf16, #tpu.memory_space<vmem>>, vector<32x64xbf16>
    %cst_37 = arith.constant dense<0.000000e+00> : vector<32x64xf32>
    %118 = tpu.matmul %115, %117, %cst_37 {dimension_numbers = #tpu.dot_dimension_numbers<[1], [0], [0], [1], [0, 0, 1, 1], [], []>} : vector<32x32xbf16>, vector<32x64xbf16>, vector<32x64xf32> -> vector<32x64xf32>
    %c0_38 = arith.constant 0 : index
    %c0_39 = arith.constant 0 : index
    %119 = vector.load %arg11[%c0_38, %c0_39] : memref<1x64xf32, #tpu.memory_space<vmem>>, vector<1x64xf32>
    %120 = vector.shape_cast %119 : vector<1x64xf32> to vector<64xf32>
    %121 = vector.shape_cast %120 : vector<64xf32> to vector<1x64xf32>
    %122 = vector.broadcast %121 : vector<1x64xf32> to vector<32x64xf32>
    %123 = arith.addf %118, %122 : vector<32x64xf32>
    %cst_40 = arith.constant 5.000000e-01 : f32
    %124 = vector.broadcast %cst_40 : f32 to vector<32x64xf32>
    %125 = arith.mulf %124, %123 : vector<32x64xf32>
    %cst_41 = arith.constant 4.471500e-02 : f32
    %126 = vector.broadcast %cst_41 : f32 to vector<32x64xf32>
    %127 = arith.mulf %126, %123 : vector<32x64xf32>
    %128 = arith.mulf %127, %123 : vector<32x64xf32>
    %129 = arith.mulf %128, %123 : vector<32x64xf32>
    %130 = arith.addf %123, %129 : vector<32x64xf32>
    %cst_42 = arith.constant 0.797884583 : f32
    %131 = vector.broadcast %cst_42 : f32 to vector<32x64xf32>
    %132 = arith.mulf %131, %130 : vector<32x64xf32>
    %133 = math.tanh %132 : vector<32x64xf32>
    %cst_43 = arith.constant 1.000000e+00 : f32
    %134 = vector.broadcast %cst_43 : f32 to vector<32x64xf32>
    %135 = arith.addf %134, %133 : vector<32x64xf32>
    %136 = arith.mulf %125, %135 : vector<32x64xf32>
    %137 = arith.truncf %136 : vector<32x64xf32> to vector<32x64xbf16>
    %c0_44 = arith.constant 0 : index
    %c0_45 = arith.constant 0 : index
    %138 = vector.load %arg12[%c0_44, %c0_45] : memref<64x32xbf16, #tpu.memory_space<vmem>>, vector<64x32xbf16>
    %cst_46 = arith.constant dense<0.000000e+00> : vector<32x32xf32>
    %139 = tpu.matmul %137, %138, %cst_46 {dimension_numbers = #tpu.dot_dimension_numbers<[1], [0], [0], [1], [0, 0, 1, 1], [], []>} : vector<32x64xbf16>, vector<64x32xbf16>, vector<32x32xf32> -> vector<32x32xf32>
    %140 = arith.addf %116, %139 : vector<32x32xf32>
    %c0_47 = arith.constant 0 : index
    %c0_48 = arith.constant 0 : index
    %141 = vector.load %arg13[%c0_47, %c0_48] : memref<1x32xf32, #tpu.memory_space<vmem>>, vector<1x32xf32>
    %142 = vector.shape_cast %141 : vector<1x32xf32> to vector<32xf32>
    %143 = vector.shape_cast %142 : vector<32xf32> to vector<1x32xf32>
    %144 = vector.broadcast %143 : vector<1x32xf32> to vector<32x32xf32>
    %145 = arith.addf %140, %144 : vector<32x32xf32>
    %146 = arith.addf %84, %145 : vector<32x32xf32>
    %147 = vector.shape_cast %146 : vector<32x32xf32> to vector<2x16x32xf32>
    %c0_49 = arith.constant 0 : index
    %c0_50 = arith.constant 0 : index
    %c0_51 = arith.constant 0 : index
    %148 = vector.load %arg14[%c0_49, %c0_50, %c0_51] : memref<2x16x32xf32, #tpu.memory_space<vmem>>, vector<2x16x32xf32>
    tpu.vector_store %arg14[%c0_49, %c0_50, %c0_51], %147 {strides = array<i32>} : memref<2x16x32xf32, #tpu.memory_space<vmem>>, vector<2x16x32xf32>,
    return
  }
  func.func @transform_0(%arg0: i32) -> (i32, i32, i32) {
    %c0_i32 = arith.constant 0 : i32
    %c0_i32_0 = arith.constant 0 : i32
    %c0_i32_1 = arith.constant 0 : i32
    return %arg0, %c0_i32, %c0_i32_0 : i32, i32, i32
  }
  func.func @transform_1(%arg0: i32) -> (i32, i32) {
    %c0_i32 = arith.constant 0 : i32
    %c0_i32_0 = arith.constant 0 : i32
    %c0_i32_1 = arith.constant 0 : i32
    return %c0_i32, %c0_i32_0 : i32, i32
  }
  func.func @transform_2(%arg0: i32) -> (i32, i32) {
    %c0_i32 = arith.constant 0 : i32
    %c0_i32_0 = arith.constant 0 : i32
    %c0_i32_1 = arith.constant 0 : i32
    return %c0_i32, %c0_i32_0 : i32, i32
  }
  func.func @transform_3(%arg0: i32) -> (i32, i32) {
    %c0_i32 = arith.constant 0 : i32
    %c0_i32_0 = arith.constant 0 : i32
    %c0_i32_1 = arith.constant 0 : i32
    return %c0_i32, %c0_i32_0 : i32, i32
  }
  func.func @transform_4(%arg0: i32) -> (i32, i32) {
    %c0_i32 = arith.constant 0 : i32
    %c0_i32_0 = arith.constant 0 : i32
    %c0_i32_1 = arith.constant 0 : i32
    return %c0_i32, %c0_i32_0 : i32, i32
  }
  func.func @transform_5(%arg0: i32) -> (i32, i32) {
    %c0_i32 = arith.constant 0 : i32
    %c0_i32_0 = arith.constant 0 : i32
    %c0_i32_1 = arith.constant 0 : i32
    return %c0_i32, %c0_i32_0 : i32, i32
  }
  func.func @transform_6(%arg0: i32) -> (i32, i32) {
    %c0_i32 = arith.constant 0 : i32
    %c0_i32_0 = arith.constant 0 : i32
    %c0_i32_1 = arith.constant 0 : i32
    return %c0_i32, %c0_i32_0 : i32, i32
  }
  func.func @transform_7(%arg0: i32) -> (i32, i32) {
    %c0_i32 = arith.constant 0 : i32
    %c0_i32_0 = arith.constant 0 : i32
    %c0_i32_1 = arith.constant 0 : i32
    return %c0_i32, %c0_i32_0 : i32, i32
  }
  func.func @transform_8(%arg0: i32) -> (i32, i32) {
    %c0_i32 = arith.constant 0 : i32
    %c0_i32_0 = arith.constant 0 : i32
    %c0_i32_1 = arith.constant 0 : i32
    return %c0_i32, %c0_i32_0 : i32, i32
  }
  func.func @transform_9(%arg0: i32) -> (i32, i32) {
    %c0_i32 = arith.constant 0 : i32
    %c0_i32_0 = arith.constant 0 : i32
    %c0_i32_1 = arith.constant 0 : i32
    return %c0_i32, %c0_i32_0 : i32, i32
  }
  func.func @transform_10(%arg0: i32) -> (i32, i32) {
    %c0_i32 = arith.constant 0 : i32
    %c0_i32_0 = arith.constant 0 : i32
    %c0_i32_1 = arith.constant 0 : i32
    return %c0_i32, %c0_i32_0 : i32, i32
  }
  func.func @transform_11(%arg0: i32) -> (i32, i32) {
    %c0_i32 = arith.constant 0 : i32
    %c0_i32_0 = arith.constant 0 : i32
    %c0_i32_1 = arith.constant 0 : i32
    return %c0_i32, %c0_i32_0 : i32, i32
  }
  func.func @transform_12(%arg0: i32) -> (i32, i32) {
    %c0_i32 = arith.constant 0 : i32
    %c0_i32_0 = arith.constant 0 : i32
    %c0_i32_1 = arith.constant 0 : i32
    return %c0_i32, %c0_i32_0 : i32, i32
  }
  func.func @transform_13(%arg0: i32) -> (i32, i32, i32) {
    %c0_i32 = arith.constant 0 : i32
    %c0_i32_0 = arith.constant 0 : i32
    %c0_i32_1 = arith.constant 0 : i32
    return %arg0, %c0_i32, %c0_i32_0 : i32, i32, i32
  }
}

</mosaic_0001>

<bundles_post_ra>
// kernel: tpu_custom_call.1
= control target key start
LH: loop header
LB: loop body
LE: loop exit
PB: predicated region body
PF: predicated region fallthrough
CT: control target
= control target key end

     0   :  { %18 = vsyncpa [#allocation3], 0  ;;  %s5220_s0 = inlined_call_operand.vmem [shape: f32[2,16,32], index: 0, kind: input, shape index: {}]   ;;  %s5221_s1 = inlined_call_operand.vmem [shape: f32[1,32], index: 1, kind: input, shape index: {}]   ;;  %s5222_s2 = inlined_call_operand.vmem [shape: f32[1,32], index: 2, kind: input, shape index: {}]   ;;  %s5223_s3 = inlined_call_operand.vmem [shape: bf16[32,96], index: 3, kind: input, shape index: {}]   ;;  %s5224_s4 = inlined_call_operand.vmem [shape: f32[1,96], index: 4, kind: input, shape index: {}]   ;;  %s5225_s5 = inlined_call_operand.hbm [shape: bf16[32,32], index: 5, kind: input, shape index: {}]   ;;  %s5226_s6 = inlined_call_operand.vmem [shape: f32[1,32], index: 6, kind: input, shape index: {}]   ;;  %s5227_s7 = inlined_call_operand.hbm [shape: f32[1,32], index: 7, kind: input, shape index: {}]   ;;  %s5228_s8 = inlined_call_operand.hbm [shape: f32[1,32], index: 8, kind: input, shape index: {}]   ;;  %s5229_s9 = inlined_call_operand.hbm [shape: bf16[32,64], index: 9, kind: input, shape index: {}]   ;;  %s5230_s10 = inlined_call_operand.hbm [shape: f32[1,64], index: 10, kind: input, shape index: {}]   ;;  %s5231_s11 = inlined_call_operand.vmem [shape: bf16[64,32], index: 11, kind: input, shape index: {}]   ;;  %s5232_s12 = inlined_call_operand.vmem [shape: f32[1,32], index: 12, kind: input, shape index: {}]   ;;  %s5233_s13 = inlined_call_operand.hbm [shape: f32[2,16,32], index: 13, kind: output, shape index: {}]  }
   0x1   :  { %19 = vsyncpa [#allocation6], 0 }
   0x2   :  { %20 = vsyncpa [#allocation9], 0 }
   0x3   :  { %21 = vsyncpa [#allocation4], 0  ;;  %s4281_s25 = smov [#allocation5]  }
   0x4   :  { %s52_s26 = sshll.u32 %s4281_s25, 4  ;;  %s53_s26 = int_to_ptr.vmem [resolvable:$true] %s52_s26 }
   0x5   :  { %s4161_s27 = scalar_lea.vmem %s53_s26, 16  ;;  %s4165_s28 = scalar_lea.vmem %s53_s26, 32 }
   0x6   :  { %p4162_p0 = scmp.ne.s32.totalorder %s53_s26, %s4161_s27  ;;  %p4166_p1 = scmp.lt.s32.totalorder %s53_s26, %s53_s26 }
   0x7   :  { %p4167_p2 = scmp.lt.s32.totalorder %s4165_s28, %s4161_s27 }
   0x9   :  { %p4168_p3 = por %p4167_p2, %p4166_p1 }
   0xb   :  { %p4169_p4 = pnand %p4168_p3, %p4162_p0 }
   0xd   :  { %4172 = shalt.err (!%p4169_p4)
}
   0xe   :  { %55 = dma.hbm_to_vmem [thread:$0]  %s5227_s7, 16, %s53_s26, [#allocation6]  }
   0xf   :  { %s4282_s14 = smov [#allocation8]   ;;  %s4283_s16 = smov [#allocation2]  }
  0x10   :  { %s71_s15 = sshll.u32 %s4282_s14, 4  ;;  %s37_s17 = sshll.u32 %s4283_s16, 4  ;;  %s72_s15 = int_to_ptr.vmem [resolvable:$true] %s71_s15  ;;  %s38_s17 = int_to_ptr.vmem [resolvable:$true] %s37_s17 }
  0x11   :  { %s4181_s18 = scalar_lea.vmem %s72_s15, 256  ;;  %p4186_p6 = scmp.lt.s32.totalorder %s72_s15, %s72_s15 }
  0x12   :  { %p4182_p5 = scmp.ne.s32.totalorder %s72_s15, %s4181_s18  ;;  %p4187_p7 = scmp.lt.s32.totalorder %s4181_s18, %s4181_s18 }
  0x14   :  { %p4188_p8 = por %p4187_p7, %p4186_p6 }
  0x16   :  { %p4189_p9 = pnand %p4188_p8, %p4182_p5 }
  0x18   :  { %4192 = shalt.err (!%p4189_p9)
}
  0x19   :  { %s4284_s19 = smov 64   ;;  %s4285_s20 = smov 4  }
  0x1a   :  { %77 = dma.hbm_to_vmem [thread:$0]  %s5229_s9, 256, %s72_s15, [#allocation9], %s4284_s19, %s4284_s19, %s4285_s20  }
  0x1b   :  { %s4201_s7 = scalar_lea.vmem %s38_s17, 256  ;;  %p4206_p11 = scmp.lt.s32.totalorder %s38_s17, %s38_s17 }
  0x1c   :  { %p4202_p10 = scmp.ne.s32.totalorder %s38_s17, %s4201_s7  ;;  %p4207_p12 = scmp.lt.s32.totalorder %s4201_s7, %s4201_s7 }
  0x1e   :  { %p4208_p13 = por %p4207_p12, %p4206_p11 }
  0x20   :  { %p4209_p0 = pnand %p4208_p13, %p4202_p10 }
  0x22   :  { %4212 = shalt.err (!%p4209_p0)
}
  0x23   :  { %43 = dma.hbm_to_vmem [thread:$0]  %s5225_s5, 256, %s38_s17, [#allocation3], %s4284_s19, %s4284_s19, %s4285_s20  }
  0x24   :  { %s4286_s25 = smov [#allocation7]   ;;  %s4287_s27 = smov [#allocation10]  }
  0x25   :  { %s62_s26 = sshll.u32 %s4286_s25, 4  ;;  %s84_s28 = sshll.u32 %s4287_s27, 4  ;;  %s63_s26 = int_to_ptr.vmem [resolvable:$true] %s62_s26  ;;  %s85_s28 = int_to_ptr.vmem [resolvable:$true] %s84_s28 }
  0x26   :  { %s4221_s9 = scalar_lea.vmem %s63_s26, 16  ;;  %s4225_s29 = scalar_lea.vmem %s63_s26, 32 }
  0x27   :  { %p4222_p1 = scmp.ne.s32.totalorder %s63_s26, %s4221_s9  ;;  %p4226_p2 = scmp.lt.s32.totalorder %s63_s26, %s63_s26 }
  0x28   :  { %p4227_p3 = scmp.lt.s32.totalorder %s4225_s29, %s4221_s9 }
  0x2a   :  { %p4228_p4 = por %p4227_p3, %p4226_p2 }
  0x2c   :  { %p4229_p5 = pnand %p4228_p4, %p4222_p1 }
  0x2e   :  { %4232 = shalt.err (!%p4229_p5)
}
  0x2f   :  { %65 = dma.hbm_to_vmem [thread:$0]  %s5228_s8, 16, %s63_s26, [#allocation6]  }
  0x30   :  { %s4241_s15 = scalar_lea.vmem %s85_s28, 16  ;;  %s4245_s5 = scalar_lea.vmem %s85_s28, 32 }
  0x31   :  { %p4242_p6 = scmp.ne.s32.totalorder %s85_s28, %s4241_s15  ;;  %p4246_p7 = scmp.lt.s32.totalorder %s85_s28, %s85_s28 }
  0x32   :  { %p4247_p8 = scmp.lt.s32.totalorder %s4245_s5, %s4241_s15 }
  0x34   :  { %p4248_p9 = por %p4247_p8, %p4246_p7 }
  0x36   :  { %p4249_p10 = pnand %p4248_p9, %p4242_p6 }
  0x38   :  { %4252 = shalt.err (!%p4249_p10)
}
  0x39   :  { %87 = dma.hbm_to_vmem [thread:$0]  %s5230_s10, 16, %s85_s28, [#allocation9]  }
  0x3a   :  { %4273 = dma.done.wait [#allocation3], 256  }
  0x3b   :  { %4274 = vsyncadd [#allocation3], 4294967040 }
  0x3c   :  { %4275 = dma.done.wait [#allocation6], 32  }
  0x3d   :  { %4276 = vsyncadd [#allocation6], 4294967264 }
  0x3e   :  { %4277 = dma.done.wait [#allocation9], 272  }
  0x3f   :  { %4278 = vsyncadd [#allocation9], 4294967024  ;;  %vm112_vm0 = vcmask 261120   ;;  %v108_v0 = vld [vmem:[%s5220_s0] sm:$0xff]  ;;  %v110_v1 = vld [vmem:[%s5220_s0 + $0x10] sm:$0xff]  ;;  %s4288_s30 = smov 112  }
  0x40   :  { %v109_v2 = vld [vmem:[%s5220_s0 + $0x8] sm:$0xff]  ;;  %v113_v3 = vsel %vm112_vm0, %v108_v0, 0.0  ;;  %v119_v4 = vsel %vm112_vm0, %v110_v1, 0.0  ;;  %v111_v5 = vld [vmem:[%s5220_s0 + $0x18] sm:$0xff]  ;;  %v4052_v29 = vld [vmem:[%s5223_s3] sm:$0xff]   ;;  %s4289_s14 = smov 120  }
  0x41   :  { %114 = vadd.xlane.f32.xlu0 %v113_v3  ;;  %120 = vadd.xlane.f32.xlu1 %v119_v4  ;;  %v116_v6 = vsel %vm112_vm0, %v109_v2, 0.0  ;;  %v122_v7 = vsel %vm112_vm0, %v111_v5, 0.0  ;;  %v4051_v28 = vld [vmem:[%s5223_s3 + $0x8] sm:$0xff]   ;;  %v3774_v44 = vld [vmem:[%s5221_s1] ss:$0 sm:$0xff]  ;;  %s4290_s15 = smov 104  }
  0x42   :  { %3898 = vmatprep.subr.bf16.mxu0 %v4051_v28  ;;  %v3775_v49 = vld [vmem:[%s5222_s2] ss:$0 sm:$0xff]  ;;  %vm4296_vm1 = vmmov 0   ;;  %vm1890_vm2 = vcmask 64512   ;;  %vm2288_vm4 = vcmask 130048   ;;  %s4298_s5 = smov 8  }
  0x43   :  { %3899 = vmatpush3.bf16.msra.mxu0 %v4051_v28  ;;  %s4299_s16 = smov 24   ;;  %vm3375_vm5 = vcmask 195584   ;;  %vm3691_vm6 = vcmask 523264   ;;  %s4300_s1 = smov [#allocation11]  }
  0x44   :  { %3900 = vmatprep.subr.bf16.mxu0 %v4052_v29  ;;  %s3760_s2 = sshll.u32 %s4300_s1, 4  ;;  %s3761_s2 = int_to_ptr.vmem [resolvable:$true] %s3760_s2 }
  0x45   :  { %117 = vadd.xlane.f32.xlu0 %v116_v6  ;;  %123 = vadd.xlane.f32.xlu1 %v122_v7  ;;  %p4258_p12 = scmp.lt.s32.totalorder %s3761_s2, %s3761_s2 }
  0x47   :  { %3901 = vmatpush3.bf16.msra.mxu0 %v4052_v29 }
  0xca   :  { %v115_v8 = vpop.xlane.xlu0 %114  ;;  %v121_v9 = vpop.xlane.xlu1 %120 }
  0xcb   :  { %v126_v10 = vmul.f32 0.03125, %v115_v8  ;;  %v128_v11 = vmul.f32 0.03125, %v121_v9  ;;  %v4292_v9 = vmov 1983009808  }
  0xcd   :  { %v130_v12 = vsub.f32 %v108_v0, %v126_v10  ;;  %v132_v13 = vsub.f32 %v110_v1, %v128_v11  ;;  %v3776_v1 = vld [vmem:[%s5224_s4] ss:$0 sm:$0xff]  ;;  %s4291_s4 = smov 96   ;;  %v324_v10 = vunpack.c.l.s4 %v4292_v9  ;;  %v326_v11 = vlaneseq }
  0xce   :  { %v118_v14 = vpop.xlane.xlu0 %117  ;;  %v124_v15 = vpop.xlane.xlu1 %123 }
  0xcf   :  { %v127_v16 = vmul.f32 0.03125, %v118_v14  ;;  %v129_v17 = vmul.f32 0.03125, %v124_v15  ;;  %v134_v18 = vmul.f32 %v130_v12, %v130_v12  ;;  %v136_v19 = vmul.f32 %v132_v13, %v132_v13 }
  0xd0   :  { %v325_v14 = vunpack.c.0.s8 %v324_v10  ;;  %v327_v15 = vshrl.u32 %v326_v11, 7 }
  0xd1   :  { %v131_v20 = vsub.f32 %v109_v2, %v127_v16  ;;  %v133_v21 = vsub.f32 %v111_v5, %v129_v17  ;;  %v138_v22 = vsel %vm112_vm0, %v134_v18, 0.0  ;;  %v144_v23 = vsel %vm112_vm0, %v136_v19, 0.0 }
  0xd2   :  { %139 = vadd.xlane.f32.xlu0 %v138_v22  ;;  %v4294_v17 = vmov 0  }
  0xd3   :  { %v135_v24 = vmul.f32 %v131_v20, %v131_v20  ;;  %v137_v25 = vmul.f32 %v133_v21, %v133_v21  ;;  %v4443_v18 = vpack.i.b16 %v4294_v17, %v4294_v17 }
  0xd5   :  { %v141_v26 = vsel %vm112_vm0, %v135_v24, 0.0  ;;  %v147_v27 = vsel %vm112_vm0, %v137_v25, 0.0  ;;  %v4455_v24 = vsub.s32 %v325_v14, %v327_v15 }
  0xd6   :  { %145 = vadd.xlane.f32.xlu0 %v144_v23  ;;  %142 = vadd.xlane.f32.xlu1 %v141_v26 }
  0xda   :  { %148 = vadd.xlane.f32.xlu1 %v147_v27 }
 0x15b   :  { %v140_v30 = vpop.xlane.xlu0 %139 }
 0x15c   :  { %v150_v31 = vmul.f32 0.03125, %v140_v30 }
 0x15e   :  { %v154_v32 = vadd.f32 1e-05, %v150_v31 }
 0x15f   :  { %v143_v33 = vpop.xlane.xlu1 %142  ;;  %v146_v34 = vpop.xlane.xlu0 %145 }
 0x160   :  { %4061 = vrsqrt.f32 %v154_v32  ;;  %v151_v35 = vmul.f32 0.03125, %v143_v33  ;;  %v152_v36 = vmul.f32 0.03125, %v146_v34 }
 0x162   :  { %v155_v37 = vadd.f32 1e-05, %v151_v35  ;;  %v156_v38 = vadd.f32 1e-05, %v152_v36 }
 0x163   :  { %v149_v39 = vpop.xlane.xlu1 %148 }
 0x164   :  { %4063 = vrsqrt.f32 %v155_v37  ;;  %v153_v40 = vmul.f32 0.03125, %v149_v39 }
 0x165   :  { %4065 = vrsqrt.f32 %v156_v38 }
 0x166   :  { %v157_v41 = vadd.f32 1e-05, %v153_v40 }
 0x168   :  { %4067 = vrsqrt.f32 %v157_v41 }
 0x16d   :  { %v4062_v42 = vpop.eup %4061 }
 0x16e   :  { %v162_v43 = vmul.f32 %v4062_v42, %v130_v12  ;;  %v4293_v12 = vmov 1934713408  }
 0x170   :  { %v173_v48 = vmul.f32 %v3774_v44, %v162_v43 }
 0x171   :  { %v4064_v45 = vpop.eup %4063 }
 0x172   :  { %v4066_v46 = vpop.eup %4065  ;;  %v163_v47 = vmul.f32 %v4064_v45, %v131_v20  ;;  %v184_v53 = vadd.f32 %v3775_v49, %v173_v48 }
 0x173   :  { %v164_v50 = vmul.f32 %v4066_v46, %v132_v13  ;;  %v355_v13 = vunpack.c.l.s4 %v4293_v12 }
 0x174   :  { %v174_v51 = vmul.f32 %v3774_v44, %v163_v47 }
 0x175   :  { %v4068_v52 = vpop.eup %4067  ;;  %v175_v56 = vmul.f32 %v3774_v44, %v164_v50  ;;  %v356_v23 = vunpack.c.0.s8 %v355_v13 }
 0x176   :  { %v185_v54 = vadd.f32 %v3775_v49, %v174_v51  ;;  %v165_v55 = vmul.f32 %v4068_v52, %v133_v21 }
 0x177   :  { %v186_v59 = vadd.f32 %v3775_v49, %v175_v56  ;;  %v4468_v32 = vsub.s32 %v356_v23, %v327_v15 }
 0x178   :  { %v188_v57 = vpack.c.bf16 %v185_v54, %v184_v53  ;;  %v176_v58 = vmul.f32 %v3774_v44, %v165_v55 }
 0x17a   :  { %3902 = vmatprep.mubr.msk.bf16.mxu0 %vm112_vm0, %v188_v57  ;;  %v187_v60 = vadd.f32 %v3775_v49, %v176_v58 }
 0x17c   :  { %v189_v61 = vpack.c.bf16 %v187_v60, %v186_v59 }
 0x17e   :  { %3903 = vmatmul.mubr.msk.bf16.vlgmr.msra.gmra.mxu0 %vm112_vm0, %v189_v61 }
 0x23e   :  { %v3904_v62 = vpop.f32.mrf.mxu0 }
 0x23f   :  { %v262_v7 = vadd.f32 %v3904_v62, %v3776_v1 }
 0x240   :  { %v253_v63 = vpop.f32.mrf.mxu0 }
 0x241   :  { %v254_v3 = vadd.f32 %v3776_v1, %v253_v63 }
 0x242   :  { %v3905_v0 = vpop.f32.mrf.mxu0 }
 0x243   :  { %v265_v5 = vadd.f32 %v3905_v0, %v3776_v1 }
 0x244   :  { %v256_v2 = vpop.f32.mrf.mxu0 }
 0x245   :  { %v257_v4 = vadd.f32 %v3776_v1, %v256_v2  ;;  %v4432_v8 = vpack.c.bf16 %v265_v5, %v262_v7 }
 0x247   :  { %v4428_v6 = vpack.c.bf16 %v257_v4, %v254_v3  ;;  %v310_v37 = vshrl.u32 %v4432_v8, 16 }
 0x249   :  { %276 = vrot.lane.b32.xlu1 %v4428_v6, %s4288_s30  ;;  %272 = vrot.lane.b32.xlu0 %v4428_v6, %s4289_s14  ;;  %v288_v21 = vshrl.u32 %v4428_v6, 16 }
 0x24d   :  { %280 = vrot.lane.b32.xlu1 %v4428_v6, %s4290_s15  ;;  %278 = vrot.lane.b32.xlu0 %v4432_v8, %s4288_s30 }
 0x251   :  { %274 = vrot.lane.b32.xlu1 %v4432_v8, %s4289_s14  ;;  %810 = vrot.lane.b32.xlu0 %v4428_v6, %s4291_s4 }
 0x255   :  { %282 = vrot.lane.b32.xlu1 %v4432_v8, %s4290_s15 }
 0x2bb   :  { %v4441_v16 = vpop.permute.xlu1 %276  ;;  %v4445_v19 = vpop.permute.xlu0 %272 }
 0x2bc   :  { %v286_v20 = vpack.i.b16 %v4445_v19, %v4428_v6  ;;  %v289_v22 = vshrl.u32 %v4445_v19, 16  ;;  %818 = vrot.lane.b32.xlu0 %v4441_v16, %s4291_s4  ;;  %814 = vrot.lane.b32.xlu1 %v4445_v19, %s4291_s4  ;;  %v296_v31 = vshrl.u32 %v4441_v16, 16 }
 0x2be   :  { %v290_v25 = vpack.i.b16 %v289_v22, %v288_v21  ;;  %v322_v26 = vcombine.high %v286_v20, %v4443_v18  ;;  %v329_v34 = vrot.slane %v286_v20, %v4455_v24 }
 0x2bf   :  { %v4458_v27 = vpop.permute.xlu1 %280  ;;  %v4463_v30 = vpop.permute.xlu0 %278 }
 0x2c0   :  { %v388_v28 = vcombine.high %v290_v25, %v4443_v18  ;;  %v294_v29 = vpack.i.b16 %v4458_v27, %v4441_v16  ;;  %812 = vrot.lane.b32.xlu0 %v4432_v8, %s4291_s4  ;;  %v297_v33 = vshrl.u32 %v4458_v27, 16  ;;  %822 = vrot.lane.b32.xlu1 %v4458_v27, %s4291_s4  ;;  %v336_v38 = vrot.slane %v322_v26, %v4455_v24 }
 0x2c1   :  { %v395_v39 = vrot.slane %v290_v25, %v4455_v24  ;;  %v318_v41 = vshrl.u32 %v4463_v30, 16 }
 0x2c2   :  { %v337_v35 = vcombine.high %v294_v29, %v4443_v18  ;;  %v344_v36 = vrot.slane %v294_v29, %v4455_v24  ;;  %v298_v40 = vpack.i.b16 %v297_v33, %v296_v31  ;;  %v402_v43 = vrot.slane %v388_v28, %v4455_v24 }
 0x2c3   :  { %v275_v42 = vpop.permute.xlu1 %274 }
 0x2c4   :  { %v351_v44 = vrot.slane %v337_v35, %v4455_v24  ;;  %v352_v45 = vcombine.low %v329_v34, %v344_v36  ;;  %v353_v46 = vcombine.high %v329_v34, %v344_v36  ;;  %820 = vrot.lane.b32.xlu0 %v4463_v30, %s4291_s4  ;;  %v403_v47 = vcombine.high %v298_v40, %v4443_v18 }
 0x2c5   :  { %v410_v48 = vrot.slane %v298_v40, %v4455_v24  ;;  %v308_v49 = vpack.i.b16 %v275_v42, %v4432_v8  ;;  %v311_v50 = vshrl.u32 %v275_v42, 16  ;;  %816 = vrot.lane.b32.xlu1 %v275_v42, %s4291_s4 }
 0x2c6   :  { %v360_v51 = vrot.slane %v352_v45, %v4468_v32  ;;  %v367_v52 = vrot.slane %v353_v46, %v4468_v32  ;;  %v368_v53 = vcombine.low %v336_v38, %v351_v44  ;;  %v369_v54 = vcombine.high %v336_v38, %v351_v44 }
 0x2c7   :  { %v417_v55 = vrot.slane %v403_v47, %v4455_v24  ;;  %v418_v56 = vcombine.low %v395_v39, %v410_v48  ;;  %v419_v57 = vcombine.high %v395_v39, %v410_v48  ;;  %v312_v58 = vpack.i.b16 %v311_v50, %v310_v37  ;;  %v4491_v59 = vpop.permute.xlu1 %282 }
 0x2c8   :  { %v376_v60 = vrot.slane %v368_v53, %v4468_v32  ;;  %v383_v61 = vrot.slane %v369_v54, %v4468_v32  ;;  %v586_v62 = vcombine.low %v360_v51, %v367_v52  ;;  %v3781_v63 = vcombine.high %v360_v51, %v367_v52  ;;  %1346 = vrot.lane.b32.xlu0 %v4428_v6, %s4284_s19 }
 0x2c9   :  { %v426_v0 = vrot.slane %v418_v56, %v4468_v32  ;;  %v433_v1 = vrot.slane %v419_v57, %v4468_v32  ;;  %v434_v2 = vcombine.low %v402_v43, %v417_v55  ;;  %v435_v3 = vcombine.high %v402_v43, %v417_v55  ;;  %824 = vrot.lane.b32.xlu1 %v4491_v59, %s4291_s4 }
 0x2ca   :  { %v602_v4 = vcombine.low %v376_v60, %v383_v61  ;;  %v3782_v5 = vcombine.high %v376_v60, %v383_v61  ;;  %v454_v7 = vcombine.high %v308_v49, %v4443_v18  ;;  %v461_v9 = vrot.slane %v308_v49, %v4455_v24 }
 0x2cb   :  { %v4504_v10 = vrot.slane %v434_v2, %v4468_v32  ;;  %v4507_v6 = vrot.slane %v435_v3, %v4468_v32  ;;  %v636_v12 = vcombine.low %v426_v0, %v433_v1  ;;  %v3783_v13 = vcombine.high %v426_v0, %v433_v1 }
 0x2cc   :  { %v468_v14 = vrot.slane %v454_v7, %v4455_v24  ;;  %v520_v15 = vcombine.high %v312_v58, %v4443_v18  ;;  %v527_v17 = vrot.slane %v312_v58, %v4455_v24  ;;  %v316_v20 = vpack.i.b16 %v4491_v59, %v4463_v30  ;;  %1348 = vrot.lane.b32.xlu0 %v4432_v8, %s4284_s19 }
 0x2cd   :  { %v319_v21 = vshrl.u32 %v4491_v59, 16  ;;  %1352 = vrot.lane.b32.xlu1 %v275_v42, %s4284_s19  ;;  %v593_v22 = vrot.slane %v586_v62, %v4455_v24  ;;  %v601_v23 = vrot.slane %v3781_v63, %v4455_v24  ;;  %v609_v25 = vrot.slane %v602_v4, %v4455_v24 }
 0x2ce   :  { %v534_v26 = vrot.slane %v520_v15, %v4455_v24  ;;  %v469_v28 = vcombine.high %v316_v20, %v4443_v18  ;;  %v476_v29 = vrot.slane %v316_v20, %v4455_v24  ;;  %v617_v31 = vrot.slane %v3782_v5, %v4455_v24 }
 0x2cf   :  { %v320_v33 = vpack.i.b16 %v319_v21, %v318_v41  ;;  %v618_v8 = vcombine.low %v593_v22, %v601_v23  ;;  %v4526_v34 = vrot.slane %v636_v12, %v4455_v24  ;;  %v4529_v35 = vrot.slane %v3783_v13, %v4455_v24 }
 0x2d0   :  { %v483_v36 = vrot.slane %v469_v28, %v4455_v24  ;;  %v484_v37 = vcombine.low %v461_v9, %v476_v29  ;;  %v485_v38 = vcombine.high %v461_v9, %v476_v29  ;;  %v626_v39 = vcombine.low %v609_v25, %v617_v31 }
 0x2d1   :  { %v535_v40 = vcombine.high %v320_v33, %v4443_v18  ;;  %v542_v42 = vrot.slane %v320_v33, %v4455_v24  ;;  %1356 = vrot.lane.b32.xlu1 %v4463_v30, %s4284_s19  ;;  %v625_v41 = vrot.slane %v618_v8, %v4468_v32  ;;  %v652_v43 = vcombine.low %v4504_v10, %v4507_v6 }
 0x2d2   :  { %v492_v44 = vrot.slane %v484_v37, %v4468_v32  ;;  %v499_v45 = vrot.slane %v485_v38, %v4468_v32  ;;  %v500_v46 = vcombine.low %v468_v14, %v483_v36  ;;  %v501_v47 = vcombine.high %v468_v14, %v483_v36 }
 0x2d3   :  { %v549_v48 = vrot.slane %v535_v40, %v4455_v24  ;;  %v550_v49 = vcombine.low %v527_v17, %v542_v42  ;;  %v551_v50 = vcombine.high %v527_v17, %v542_v42  ;;  %v4295_v54 = vmov 0.0  }
 0x2d4   :  { %v508_v51 = vrot.slane %v500_v46, %v4468_v32  ;;  %v515_v52 = vrot.slane %v501_v47, %v4468_v32  ;;  %v686_v30 = vcombine.low %v492_v44, %v499_v45  ;;  %v3785_v53 = vcombine.high %v492_v44, %v499_v45  ;;  %3906 = vmatprep.subr.bf16.mxu1 %v4295_v54 }
 0x2d5   :  { %v558_v55 = vrot.slane %v550_v49, %v4468_v32  ;;  %v565_v56 = vrot.slane %v551_v50, %v4468_v32  ;;  %v566_v57 = vcombine.low %v534_v26, %v549_v48  ;;  %v567_v58 = vcombine.high %v534_v26, %v549_v48  ;;  %1350 = vrot.lane.b32.xlu1 %v4445_v19, %s4284_s19 }
 0x2d6   :  { %v693_v60 = vrot.slane %v686_v30, %v4455_v24  ;;  %v701_v61 = vrot.slane %v3785_v53, %v4455_v24  ;;  %v702_v62 = vcombine.low %v508_v51, %v515_v52  ;;  %v3786_v63 = vcombine.high %v508_v51, %v515_v52  ;;  %3912 = vmatprep.subr.bf16.mxu0 %v4295_v54 }
 0x2d7   :  { %v574_v0 = vrot.slane %v566_v57, %v4468_v32  ;;  %v581_v1 = vrot.slane %v567_v58, %v4468_v32  ;;  %v736_v2 = vcombine.low %v558_v55, %v565_v56  ;;  %v3787_v3 = vcombine.high %v558_v55, %v565_v56  ;;  %3908 = vmatprep.mubr.msk.bf16.mxu1 %vm4296_vm1, %v4295_v54  ;;  %v811_v57 = vpop.permute.xlu0 %810 }
 0x2d8   :  { %v709_v4 = vrot.slane %v702_v62, %v4455_v24  ;;  %v717_v5 = vrot.slane %v3786_v63, %v4455_v24  ;;  %v718_v7 = vcombine.low %v693_v60, %v701_v61  ;;  %v633_v19 = vrot.slane %v626_v39, %v4468_v32  ;;  %3914 = vmatprep.mubr.msk.bf16.mxu0 %vm4296_vm1, %v4295_v54 }
 0x2d9   :  { %v743_v9 = vrot.slane %v736_v2, %v4455_v24  ;;  %v751_v12 = vrot.slane %v3787_v3, %v4455_v24  ;;  %v752_v13 = vcombine.low %v574_v0, %v581_v1  ;;  %v3788_v14 = vcombine.high %v574_v0, %v581_v1  ;;  %1354 = vrot.lane.b32.xlu1 %v4441_v16, %s4284_s19 }
 0x2da   :  { %v4561_v15 = vcombine.low %v625_v41, %v633_v19  ;;  %v4563_v17 = vcombine.high %v625_v41, %v633_v19  ;;  %v659_v20 = vrot.slane %v652_v43, %v4455_v24  ;;  %v3784_v21 = vcombine.high %v4504_v10, %v4507_v6 }
 0x2db   :  { %v759_v22 = vrot.slane %v752_v13, %v4455_v24  ;;  %v767_v23 = vrot.slane %v3788_v14, %v4455_v24  ;;  %v668_v25 = vcombine.low %v4526_v34, %v4529_v35  ;;  %v726_v16 = vcombine.low %v709_v4, %v717_v5 }
 0x2dc   :  { %v667_v26 = vrot.slane %v3784_v21, %v4455_v24  ;;  %v768_v28 = vcombine.low %v743_v9, %v751_v12  ;;  %v725_v33 = vrot.slane %v718_v7, %v4468_v32  ;;  %v789_v40 = vshrl.u32 %v4561_v15, 16 }
 0x2dd   :  { %1358 = vrot.lane.b32.xlu1 %v4458_v27, %s4284_s19  ;;  %v776_v29 = vcombine.low %v759_v22, %v767_v23  ;;  %v733_v10 = vrot.slane %v726_v16, %v4468_v32  ;;  %v675_v36 = vrot.slane %v668_v25, %v4468_v32  ;;  %v795_v41 = vshrl.u32 %v4563_v17, 16 }
 0x2de   :  { %v676_v31 = vcombine.low %v659_v20, %v667_v26  ;;  %v775_v6 = vrot.slane %v768_v28, %v4468_v32  ;;  %v830_v63 = vshrl.u32 %v811_v57, 16 }
 0x2df   :  { %v783_v8 = vrot.slane %v776_v29, %v4468_v32  ;;  %v4581_v35 = vcombine.low %v725_v33, %v733_v10  ;;  %v4585_v27 = vcombine.high %v725_v33, %v733_v10 }
 0x2e0   :  { %v683_v34 = vrot.slane %v676_v31, %v4468_v32 }
 0x2e1   :  { %v4583_v37 = vcombine.low %v775_v6, %v783_v8  ;;  %v4596_v42 = vcombine.high %v775_v6, %v783_v8  ;;  %v801_v44 = vshrl.u32 %v4581_v35, 16  ;;  %v807_v52 = vshrl.u32 %v4585_v27, 16 }
 0x2e2   :  { %v4589_v38 = vcombine.low %v675_v36, %v683_v34  ;;  %v4591_v39 = vcombine.high %v675_v36, %v683_v34 }
 0x2e3   :  { %v800_v43 = vpack.i.b16 %v4583_v37, %v4581_v35  ;;  %v802_v45 = vshrl.u32 %v4583_v37, 16  ;;  %v806_v51 = vpack.i.b16 %v4596_v42, %v4585_v27  ;;  %v808_v30 = vshrl.u32 %v4596_v42, 16 }
 0x2e4   :  { %v788_v46 = vpack.i.b16 %v4589_v38, %v4561_v15  ;;  %v790_v47 = vshrl.u32 %v4589_v38, 16  ;;  %v794_v48 = vpack.i.b16 %v4591_v39, %v4563_v17  ;;  %v796_v49 = vshrl.u32 %v4591_v39, 16 }
 0x2e5   :  { %v4609_v50 = vpack.i.b16 %v802_v45, %v801_v44  ;;  %v4619_v56 = vpack.i.b16 %v808_v30, %v807_v52  ;;  %v4856_v27 = vand.u32 127, %v326_v11 }
 0x2e6   :  { %v4615_v53 = vpack.i.b16 %v790_v47, %v789_v40  ;;  %v4617_v55 = vpack.i.b16 %v796_v49, %v795_v41 }
 0x2e7   :  { %vm2269_vm3 = vcmp.lt.s32.totalorder %v4856_v27, 8 }
 0x32e   :  { %v815_v58 = vpop.permute.xlu1 %814  ;;  %v819_v61 = vpop.permute.xlu0 %818 }
 0x32f   :  { %v828_v60 = vpack.i.b16 %v815_v58, %v811_v57  ;;  %v831_v62 = vshrl.u32 %v815_v58, 16  ;;  %v838_v2 = vshrl.u32 %v819_v61, 16 }
 0x331   :  { %v858_v0 = vcombine.high %v828_v60, %v4443_v18  ;;  %v832_v5 = vpack.i.b16 %v831_v62, %v830_v63  ;;  %v865_v7 = vrot.slane %v828_v60, %v4455_v24 }
 0x332   :  { %v823_v1 = vpop.permute.xlu1 %822  ;;  %v813_v13 = vpop.permute.xlu0 %812 }
 0x333   :  { %v836_v3 = vpack.i.b16 %v823_v1, %v819_v61  ;;  %v839_v4 = vshrl.u32 %v823_v1, 16  ;;  %v872_v14 = vrot.slane %v858_v0, %v4455_v24  ;;  %v924_v26 = vcombine.high %v832_v5, %v4443_v18 }
 0x334   :  { %v931_v31 = vrot.slane %v832_v5, %v4455_v24  ;;  %v846_v47 = vshrl.u32 %v813_v13, 16 }
 0x335   :  { %v840_v19 = vpack.i.b16 %v839_v4, %v838_v2  ;;  %v873_v9 = vcombine.high %v836_v3, %v4443_v18  ;;  %v880_v12 = vrot.slane %v836_v3, %v4455_v24  ;;  %v938_v41 = vrot.slane %v924_v26, %v4455_v24 }
 0x336   :  { %v821_v40 = vpop.permute.xlu0 %820 }
 0x337   :  { %v817_v20 = vpop.permute.xlu1 %816  ;;  %v887_v21 = vrot.slane %v873_v9, %v4455_v24  ;;  %v888_v22 = vcombine.low %v865_v7, %v880_v12  ;;  %v889_v23 = vcombine.high %v865_v7, %v880_v12  ;;  %v939_v25 = vcombine.high %v840_v19, %v4443_v18 }
 0x338   :  { %v946_v16 = vrot.slane %v840_v19, %v4455_v24  ;;  %v847_v10 = vshrl.u32 %v817_v20, 16  ;;  %v844_v34 = vpack.i.b16 %v817_v20, %v813_v13  ;;  %v854_v58 = vshrl.u32 %v821_v40, 16 }
 0x339   :  { %v904_v28 = vcombine.low %v872_v14, %v887_v21  ;;  %v905_v29 = vcombine.high %v872_v14, %v887_v21  ;;  %v953_v33 = vrot.slane %v939_v25, %v4455_v24  ;;  %v4633_v8 = vrot.slane %v888_v22, %v4468_v32 }
 0x33a   :  { %v4636_v36 = vrot.slane %v889_v23, %v4468_v32  ;;  %v954_v44 = vcombine.low %v931_v31, %v946_v16  ;;  %v955_v45 = vcombine.high %v931_v31, %v946_v16  ;;  %v848_v57 = vpack.i.b16 %v847_v10, %v846_v47 }
 0x33b   :  { %v825_v6 = vpop.permute.xlu1 %824  ;;  %v4640_v49 = vrot.slane %v904_v28, %v4468_v32  ;;  %v4643_v52 = vrot.slane %v905_v29, %v4468_v32  ;;  %v970_v30 = vcombine.low %v938_v41, %v953_v33  ;;  %v990_v63 = vcombine.high %v844_v34, %v4443_v18 }
 0x33c   :  { %v1122_v61 = vcombine.low %v4633_v8, %v4636_v36  ;;  %v3789_v62 = vcombine.high %v4633_v8, %v4636_v36  ;;  %v852_v0 = vpack.i.b16 %v825_v6, %v821_v40  ;;  %v4653_v1 = vrot.slane %v954_v44, %v4468_v32  ;;  %v1347_v44 = vpop.permute.xlu0 %1346 }
 0x33d   :  { %v4656_v2 = vrot.slane %v955_v45, %v4468_v32  ;;  %v971_v3 = vcombine.high %v938_v41, %v953_v33  ;;  %v855_v4 = vshrl.u32 %v825_v6, 16  ;;  %v1138_v5 = vcombine.low %v4640_v49, %v4643_v52 }
 0x33e   :  { %v997_v7 = vrot.slane %v844_v34, %v4455_v24  ;;  %v1005_v19 = vcombine.high %v852_v0, %v4443_v18  ;;  %v1012_v9 = vrot.slane %v852_v0, %v4455_v24  ;;  %v4664_v12 = vrot.slane %v970_v30, %v4468_v32 }
 0x33f   :  { %v4645_v60 = vpop.permute.xlu1 %1352  ;;  %v3790_v13 = vcombine.high %v4640_v49, %v4643_v52  ;;  %v1056_v14 = vcombine.high %v848_v57, %v4443_v18  ;;  %v856_v20 = vpack.i.b16 %v855_v4, %v854_v58  ;;  %v1004_v22 = vrot.slane %v990_v63, %v4455_v24 }
 0x340   :  { %v1019_v23 = vrot.slane %v1005_v19, %v4455_v24  ;;  %v1020_v25 = vcombine.low %v997_v7, %v1012_v9  ;;  %v1021_v26 = vcombine.high %v997_v7, %v1012_v9  ;;  %v4674_v16 = vrot.slane %v971_v3, %v4468_v32 }
 0x341   :  { %v1063_v28 = vrot.slane %v848_v57, %v4455_v24  ;;  %v1071_v29 = vcombine.high %v856_v20, %v4443_v18  ;;  %v1078_v31 = vrot.slane %v856_v20, %v4455_v24  ;;  %v1070_v36 = vrot.slane %v1056_v14, %v4455_v24 }
 0x342   :  { %v1028_v33 = vrot.slane %v1020_v25, %v4468_v32  ;;  %v1035_v10 = vrot.slane %v1021_v26, %v4468_v32  ;;  %v1036_v6 = vcombine.low %v1004_v22, %v1019_v23  ;;  %v1037_v8 = vcombine.high %v1004_v22, %v1019_v23 }
 0x343   :  { %v4669_v21 = vpop.permute.xlu1 %1356  ;;  %v1085_v34 = vrot.slane %v1071_v29, %v4455_v24  ;;  %v1086_v40 = vcombine.low %v1063_v28, %v1078_v31  ;;  %v1087_v41 = vcombine.high %v1063_v28, %v1078_v31  ;;  %v1172_v3 = vcombine.low %v4653_v1, %v4656_v2 }
 0x344   :  { %v1044_v47 = vrot.slane %v1036_v6, %v4468_v32  ;;  %v1051_v49 = vrot.slane %v1037_v8, %v4468_v32  ;;  %v1222_v52 = vcombine.low %v1028_v33, %v1035_v10  ;;  %v3793_v30 = vcombine.high %v1028_v33, %v1035_v10 }
 0x345   :  { %v4686_v57 = vrot.slane %v1086_v40, %v4468_v32  ;;  %v4689_v58 = vrot.slane %v1087_v41, %v4468_v32  ;;  %v1102_v63 = vcombine.low %v1070_v36, %v1085_v34  ;;  %v1103_v0 = vcombine.high %v1070_v36, %v1085_v34 }
 0x346   :  { %v3791_v4 = vcombine.high %v4653_v1, %v4656_v2  ;;  %v1366_v7 = vshrl.u32 %v1347_v44, 16  ;;  %v1129_v19 = vrot.slane %v1122_v61, %v4455_v24  ;;  %v4703_v20 = vrot.slane %v1222_v52, %v4455_v24 }
 0x347   :  { %v1351_v45 = vpop.permute.xlu1 %1350  ;;  %v4697_v9 = vrot.slane %v1102_v63, %v4468_v32  ;;  %v4700_v14 = vrot.slane %v1103_v0, %v4468_v32  ;;  %v4706_v22 = vrot.slane %v3793_v30, %v4455_v24  ;;  %v1238_v25 = vcombine.low %v1044_v47, %v1051_v49 }
 0x348   :  { %v3794_v26 = vcombine.high %v1044_v47, %v1051_v49  ;;  %v1364_v28 = vpack.i.b16 %v1351_v45, %v1347_v44  ;;  %v1367_v1 = vshrl.u32 %v1351_v45, 16  ;;  %v1272_v61 = vcombine.low %v4686_v57, %v4689_v58 }
 0x349   :  { %v3795_v2 = vcombine.high %v4686_v57, %v4689_v58  ;;  %v1288_v29 = vcombine.low %v4697_v9, %v4700_v14  ;;  %v1137_v31 = vrot.slane %v3789_v62, %v4455_v24  ;;  %v3796_v33 = vcombine.high %v4697_v9, %v4700_v14 }
 0x34a   :  { %v1368_v10 = vpack.i.b16 %v1367_v1, %v1366_v7  ;;  %v1394_v6 = vcombine.high %v1364_v28, %v4443_v18  ;;  %v1145_v8 = vrot.slane %v1138_v5, %v4455_v24  ;;  %v1153_v36 = vrot.slane %v3790_v13, %v4455_v24 }
 0x34b   :  { %v1355_v23 = vpop.permute.xlu1 %1354  ;;  %v1154_v34 = vcombine.low %v1129_v19, %v1137_v31  ;;  %v1179_v40 = vrot.slane %v1172_v3, %v4455_v24  ;;  %v1187_v41 = vrot.slane %v3791_v4, %v4455_v24  ;;  %v1401_v45 = vrot.slane %v1364_v28, %v4455_v24 }
 0x34c   :  { %v1460_v62 = vcombine.high %v1368_v10, %v4443_v18  ;;  %v1374_v47 = vshrl.u32 %v1355_v23, 16  ;;  %v1188_v49 = vcombine.low %v4664_v12, %v4674_v16  ;;  %v1408_v52 = vrot.slane %v1394_v6, %v4455_v24 }
 0x34d   :  { %v1162_v30 = vcombine.low %v1145_v8, %v1153_v36  ;;  %v3792_v5 = vcombine.high %v4664_v12, %v4674_v16  ;;  %v1204_v13 = vcombine.low %v1179_v40, %v1187_v41  ;;  %v1467_v63 = vrot.slane %v1368_v10, %v4455_v24 }
 0x34e   :  { %v1195_v0 = vrot.slane %v1188_v49, %v4455_v24  ;;  %v1474_v7 = vrot.slane %v1460_v62, %v4455_v24  ;;  %v1161_v19 = vrot.slane %v1154_v34, %v4468_v32  ;;  %v1253_v36 = vrot.slane %v3794_v26, %v4455_v24 }
 0x34f   :  { %v1359_v44 = vpop.permute.xlu1 %1358  ;;  %v1169_v28 = vrot.slane %v1162_v30, %v4468_v32  ;;  %v1203_v1 = vrot.slane %v3792_v5, %v4455_v24  ;;  %v1211_v31 = vrot.slane %v1204_v13, %v4468_v32  ;;  %v1254_v30 = vcombine.low %v4703_v20, %v4706_v22 }
 0x350   :  { %v1372_v3 = vpack.i.b16 %v1359_v44, %v1355_v23  ;;  %v1375_v4 = vshrl.u32 %v1359_v44, 16  ;;  %v1245_v23 = vrot.slane %v1238_v25, %v4455_v24 }
 0x351   :  { %v1170_v10 = vcombine.low %v1161_v19, %v1169_v28  ;;  %v1212_v8 = vcombine.low %v1195_v0, %v1203_v1  ;;  %v1171_v49 = vcombine.high %v1161_v19, %v1169_v28 }
 0x352   :  { %v1376_v6 = vpack.i.b16 %v1375_v4, %v1374_v47  ;;  %v1409_v12 = vcombine.high %v1372_v3, %v4443_v18  ;;  %v1416_v16 = vrot.slane %v1372_v3, %v4455_v24 }
 0x353   :  { %v1219_v62 = vrot.slane %v1212_v8, %v4468_v32  ;;  %v1325_v8 = vshrl.u32 %v1170_v10, 16 }
 0x354   :  { %v1423_v40 = vrot.slane %v1409_v12, %v4455_v24  ;;  %v1424_v34 = vcombine.low %v1401_v45, %v1416_v16  ;;  %v1425_v41 = vcombine.high %v1401_v45, %v1416_v16  ;;  %v1475_v44 = vcombine.high %v1376_v6, %v4443_v18 }
 0x355   :  { %v1482_v47 = vrot.slane %v1376_v6, %v4455_v24  ;;  %v1220_v0 = vcombine.low %v1211_v31, %v1219_v62 }
 0x356   :  { %v1432_v5 = vrot.slane %v1424_v34, %v4468_v32  ;;  %v1439_v25 = vrot.slane %v1425_v41, %v4468_v32  ;;  %v1440_v13 = vcombine.low %v1408_v52, %v1423_v40  ;;  %v1441_v26 = vcombine.high %v1408_v52, %v1423_v40 }
 0x357   :  { %v1489_v3 = vrot.slane %v1475_v44, %v4455_v24  ;;  %v1490_v45 = vcombine.low %v1467_v63, %v1482_v47  ;;  %v1491_v4 = vcombine.high %v1467_v63, %v1482_v47  ;;  %v1324_v28 = vpack.i.b16 %v1220_v0, %v1170_v10 }
 0x358   :  { %v1448_v1 = vrot.slane %v1440_v13, %v4468_v32  ;;  %v1455_v12 = vrot.slane %v1441_v26, %v4468_v32  ;;  %v1658_v6 = vcombine.low %v1432_v5, %v1439_v25  ;;  %v3797_v19 = vcombine.high %v1432_v5, %v1439_v25 }
 0x359   :  { %v1326_v16 = vshrl.u32 %v1220_v0, 16  ;;  %v1498_v20 = vrot.slane %v1490_v45, %v4468_v32  ;;  %v1505_v22 = vrot.slane %v1491_v4, %v4468_v32  ;;  %v1506_v34 = vcombine.low %v1474_v7, %v1489_v3 }
 0x35a   :  { %v1507_v52 = vcombine.high %v1474_v7, %v1489_v3  ;;  %v1331_v40 = vshrl.u32 %v1171_v49, 16  ;;  %v1895_v41 = vsel %vm1890_vm2, %v1324_v28, 0  ;;  %v1674_v44 = vcombine.low %v1448_v1, %v1455_v12 }
 0x35b   :  { %v3798_v63 = vcombine.high %v1448_v1, %v1455_v12  ;;  %v1708_v47 = vcombine.low %v1498_v20, %v1505_v22  ;;  %3907 = vmatpush3.bf16.xpose.msra.mxu1 %v1895_v41  ;;  %v1514_v13 = vrot.slane %v1506_v34, %v4468_v32  ;;  %v3799_v25 = vcombine.high %v1498_v20, %v1505_v22 }
 0x35c   :  { %v1521_v5 = vrot.slane %v1507_v52, %v4468_v32  ;;  %v1327_v26 = vpack.i.b16 %v1326_v16, %v1325_v8  ;;  %v1665_v0 = vrot.slane %v1658_v6, %v4455_v24  ;;  %v1673_v45 = vrot.slane %v3797_v19, %v4455_v24  ;;  %3918 = vmatprep.subr.bf16.mxu1 %v4295_v54 }
 0x35d   :  { %v1681_v10 = vrot.slane %v1674_v44, %v4455_v24  ;;  %v1221_v7 = vcombine.high %v1211_v31, %v1219_v62  ;;  %v1689_v3 = vrot.slane %v3798_v63, %v4455_v24  ;;  %v1715_v4 = vrot.slane %v1708_v47, %v4455_v24 }
 0x35e   :  { %v1723_v1 = vrot.slane %v3799_v25, %v4455_v24  ;;  %v1942_v12 = vsel %vm1890_vm2, %v1327_v26, 0  ;;  %v1724_v28 = vcombine.low %v1514_v13, %v1521_v5  ;;  %v1262_v6 = vcombine.low %v1245_v23, %v1253_v36 }
 0x35f   :  { %3913 = vmatpush3.bf16.xpose.msra.mxu0 %v1942_v12  ;;  %v1330_v16 = vpack.i.b16 %v1221_v7, %v1171_v49  ;;  %v1332_v20 = vshrl.u32 %v1221_v7, 16  ;;  %v1279_v31 = vrot.slane %v1272_v61, %v4455_v24  ;;  %v1287_v62 = vrot.slane %v3795_v2, %v4455_v24 }
 0x360   :  { %3924 = vmatprep.subr.bf16.mxu0 %v4295_v54  ;;  %v1295_v19 = vrot.slane %v1288_v29, %v4455_v24  ;;  %v1303_v23 = vrot.slane %v3796_v33, %v4455_v24  ;;  %v3800_v36 = vcombine.high %v1514_v13, %v1521_v5  ;;  %v1261_v49 = vrot.slane %v1254_v30, %v4468_v32 }
 0x361   :  { %v1269_v61 = vrot.slane %v1262_v6, %v4468_v32  ;;  %v1690_v22 = vcombine.low %v1665_v0, %v1673_v45  ;;  %v1333_v8 = vpack.i.b16 %v1332_v20, %v1331_v40  ;;  %v1304_v34 = vcombine.low %v1279_v31, %v1287_v62 }
 0x362   :  { %v1312_v57 = vcombine.low %v1295_v19, %v1303_v23  ;;  %v1698_v58 = vcombine.low %v1681_v10, %v1689_v3  ;;  %3909 = vmatmul.mubr.msk.bf16.vlgmr.msra.gmra.mxu1 %vm1890_vm2, %v788_v46  ;;  %v1989_v2 = vsel %vm1890_vm2, %v1330_v16, 0  ;;  %v1731_v14 = vrot.slane %v1724_v28, %v4455_v24 }
 0x363   :  { %v1270_v29 = vcombine.low %v1261_v49, %v1269_v61  ;;  %v1697_v9 = vrot.slane %v1690_v22, %v4468_v32  ;;  %3919 = vmatpush3.bf16.xpose.msra.mxu1 %v1989_v2  ;;  %3920 = vmatprep.mubr.msk.bf16.mxu1 %vm4296_vm1, %v4295_v54  ;;  %v1311_v33 = vrot.slane %v1304_v34, %v4468_v32  ;;  %v2036_v46 = vsel %vm1890_vm2, %v1333_v8, 0 }
 0x364   :  { %v1319_v30 = vrot.slane %v1312_v57, %v4468_v32  ;;  %v1705_v52 = vrot.slane %v1698_v58, %v4468_v32  ;;  %3930 = vmatprep.subr.bf16.mxu1 %v4295_v54  ;;  %v1739_v15 = vrot.slane %v3800_v36, %v4455_v24  ;;  %v1740_v38 = vcombine.low %v1715_v4, %v1723_v1 }
 0x365   :  { %v1337_v47 = vshrl.u32 %v1270_v29, 16  ;;  %v1271_v10 = vcombine.high %v1261_v49, %v1269_v61 }
 0x366   :  { %3915 = vmatmul.mubr.msk.bf16.vlgmr.msra.gmra.mxu0 %vm1890_vm2, %v4615_v53  ;;  %v1320_v40 = vcombine.low %v1311_v33, %v1319_v30  ;;  %v4800_v41 = vcombine.high %v1697_v9, %v1705_v52  ;;  %v1748_v44 = vcombine.low %v1731_v14, %v1739_v15  ;;  %v1747_v5 = vrot.slane %v1740_v38, %v4468_v32 }
 0x367   :  { %3925 = vmatpush3.bf16.xpose.msra.mxu0 %v2036_v46  ;;  %3926 = vmatprep.mubr.msk.bf16.mxu0 %vm4296_vm1, %v4295_v54  ;;  %v1321_v26 = vcombine.high %v1311_v33, %v1319_v30  ;;  %v1343_v12 = vshrl.u32 %v1271_v10, 16  ;;  %v1706_v35 = vcombine.low %v1697_v9, %v1705_v52 }
 0x368   :  { %v1336_v63 = vpack.i.b16 %v1320_v40, %v1270_v29  ;;  %3936 = vmatprep.subr.bf16.mxu0 %v4295_v54  ;;  %v1338_v13 = vshrl.u32 %v1320_v40, 16  ;;  %v1755_v25 = vrot.slane %v1748_v44, %v4468_v32  ;;  %v1870_v3 = vshrl.u32 %v4800_v41, 16 }
 0x369   :  { %v1342_v4 = vpack.i.b16 %v1321_v26, %v1271_v10  ;;  %v1862_v6 = vshrl.u32 %v1706_v35, 16 }
 0x36a   :  { %v1339_v53 = vpack.i.b16 %v1338_v13, %v1337_v47  ;;  %3921 = vmatmul.mubr.msk.bf16.vlgmr.msra.gmra.mxu1 %vm1890_vm2, %v794_v48  ;;  %v2083_v0 = vsel %vm1890_vm2, %v1336_v63, 0  ;;  %v4812_v45 = vcombine.high %v1747_v5, %v1755_v25  ;;  %v1344_v48 = vshrl.u32 %v1321_v26, 16 }
 0x36b   :  { %3931 = vmatpush3.bf16.xpose.msra.mxu1 %v2083_v0  ;;  %3932 = vmatprep.mubr.msk.bf16.mxu1 %vm4296_vm1, %v4295_v54  ;;  %v1756_v16 = vcombine.low %v1747_v5, %v1755_v25 }
 0x36c   :  { %3942 = vmatprep.subr.bf16.mxu1 %v4295_v54  ;;  %v1868_v7 = vpack.i.b16 %v4812_v45, %v4800_v41  ;;  %v1871_v17 = vshrl.u32 %v4812_v45, 16  ;;  %v2130_v39 = vsel %vm1890_vm2, %v1339_v53, 0  ;;  %v1345_v28 = vpack.i.b16 %v1344_v48, %v1343_v12 }
 0x36d   :  { %v1863_v37 = vshrl.u32 %v1756_v16, 16 }
 0x36e   :  { %3927 = vmatmul.mubr.msk.bf16.vlgmr.msra.gmra.mxu0 %vm1890_vm2, %v4617_v55  ;;  %v4826_v1 = vpack.i.b16 %v1871_v17, %v1870_v3  ;;  %v2177_v55 = vsel %vm1890_vm2, %v1342_v4, 0  ;;  %v2224_v20 = vsel %vm1890_vm2, %v1345_v28, 0 }
 0x36f   :  { %3937 = vmatpush3.bf16.xpose.msra.mxu0 %v2130_v39  ;;  %3938 = vmatprep.mubr.msk.bf16.mxu0 %vm4296_vm1, %v4295_v54 }
 0x370   :  { %3948 = vmatprep.subr.bf16.mxu0 %v4295_v54 }
 0x372   :  { %3933 = vmatmul.mubr.msk.bf16.vlgmr.msra.gmra.mxu1 %vm1890_vm2, %v800_v43  ;;  %v1860_v43 = vpack.i.b16 %v1756_v16, %v1706_v35 }
 0x373   :  { %3943 = vmatpush3.bf16.xpose.msra.mxu1 %v2177_v55  ;;  %3944 = vmatprep.mubr.msk.bf16.mxu1 %vm4296_vm1, %v4295_v54 }
 0x374   :  { %3954 = vmatprep.subr.bf16.mxu1 %v4295_v54 }
 0x376   :  { %3939 = vmatmul.mubr.msk.bf16.vlgmr.msra.gmra.mxu0 %vm1890_vm2, %v4609_v50  ;;  %v1864_v50 = vpack.i.b16 %v1863_v37, %v1862_v6 }
 0x377   :  { %3949 = vmatpush3.bf16.xpose.msra.mxu0 %v2224_v20  ;;  %3950 = vmatprep.mubr.msk.bf16.mxu0 %vm4296_vm1, %v4295_v54 }
 0x378   :  { %3960 = vmatprep.subr.bf16.mxu0 %v4295_v54 }
 0x37a   :  { %3945 = vmatmul.mubr.msk.bf16.vlgmr.msra.gmra.mxu1 %vm1890_vm2, %v806_v51 }
 0x37b   :  { %3955 = vmatpush3.bf16.msra.mxu1 %v1860_v43  ;;  %3956 = vmatprep.mubr.msk.bf16.mxu1 %vm4296_vm1, %v4295_v54 }
 0x37c   :  { %3966 = vmatprep.subr.bf16.mxu1 %v4295_v54 }
 0x37e   :  { %3951 = vmatmul.mubr.msk.bf16.vlgmr.msra.gmra.mxu0 %vm1890_vm2, %v4619_v56 }
 0x37f   :  { %3961 = vmatpush3.bf16.msra.mxu0 %v1864_v50  ;;  %3962 = vmatprep.mubr.msk.bf16.mxu0 %vm4296_vm1, %v4295_v54 }
 0x380   :  { %3972 = vmatprep.subr.bf16.mxu0 %v4295_v54 }
 0x422   :  { %v1931_v42 = vpop.f32.mrf.mxu1 }
 0x423   :  { %v4861_v51 = vsel %vm2269_vm3, %v1931_v42, -1e+30 }
 0x424   :  { %v3910_v31 = vpop.f32.mrf.mxu1  ;;  %v2289_v56 = vsel %vm2288_vm4, %v4861_v51, -inf }
 0x425   :  { %2290 = vmax.xlane.f32.xlu0 %v2289_v56 }
 0x426   :  { %v1978_v62 = vpop.f32.mrf.mxu0  ;;  %v1934_v11 = vpop.f32.mrf.mxu1 }
 0x427   :  { %v4867_v19 = vsel %vm2269_vm3, %v1978_v62, -1e+30  ;;  %v4871_v23 = vsel %vm2269_vm3, %v1934_v11, -1e+30 }
 0x428   :  { %v3916_v36 = vpop.f32.mrf.mxu0  ;;  %v3911_v49 = vpop.f32.mrf.mxu1  ;;  %v2295_v61 = vsel %vm2288_vm4, %v4867_v19, -inf  ;;  %v2292_v22 = vsel %vm2288_vm4, %v4871_v23, -inf }
 0x429   :  { %2296 = vmax.xlane.f32.xlu0 %v2295_v61  ;;  %2293 = vmax.xlane.f32.xlu1 %v2292_v22 }
 0x42a   :  { %v1981_v8 = vpop.f32.mrf.mxu0  ;;  %v2025_v57 = vpop.f32.mrf.mxu1 }
 0x42b   :  { %v4879_v34 = vsel %vm2269_vm3, %v1981_v8, -1e+30  ;;  %v4885_v9 = vsel %vm2269_vm3, %v2025_v57, -1e+30 }
 0x42c   :  { %v3917_v58 = vpop.f32.mrf.mxu0  ;;  %v3922_v2 = vpop.f32.mrf.mxu1  ;;  %v2298_v29 = vsel %vm2288_vm4, %v4879_v34, -inf  ;;  %v2301_v38 = vsel %vm2288_vm4, %v4885_v9, -inf }
 0x42d   :  { %2299 = vmax.xlane.f32.xlu0 %v2298_v29  ;;  %v1349_v2 = vpop.permute.xlu0 %1348 }
 0x42e   :  { %v2072_v14 = vpop.f32.mrf.mxu0  ;;  %v2028_v33 = vpop.f32.mrf.mxu1 }
 0x42f   :  { %v4889_v30 = vsel %vm2269_vm3, %v2028_v33, -1e+30  ;;  %v4897_v40 = vsel %vm2269_vm3, %v2072_v14, -1e+30 }
 0x430   :  { %v3928_v52 = vpop.f32.mrf.mxu0  ;;  %v3923_v15 = vpop.f32.mrf.mxu1  ;;  %v2304_v46 = vsel %vm2288_vm4, %v4889_v30, -inf  ;;  %v2307_v5 = vsel %vm2288_vm4, %v4897_v40, -inf }
 0x431   :  { %2302 = vmax.xlane.f32.xlu0 %v2301_v38  ;;  %2305 = vmax.xlane.f32.xlu1 %v2304_v46 }
 0x432   :  { %v2075_v44 = vpop.f32.mrf.mxu0  ;;  %v2119_v63 = vpop.f32.mrf.mxu1 }
 0x433   :  { %v4903_v25 = vsel %vm2269_vm3, %v2075_v44, -1e+30  ;;  %v4915_v48 = vsel %vm2269_vm3, %v2119_v63, -1e+30 }
 0x434   :  { %v3929_v47 = vpop.f32.mrf.mxu0  ;;  %v3934_v13 = vpop.f32.mrf.mxu1  ;;  %v2310_v17 = vsel %vm2288_vm4, %v4903_v25, -inf  ;;  %v2313_v20 = vsel %vm2288_vm4, %v4915_v48, -inf }
 0x435   :  { %2308 = vmax.xlane.f32.xlu0 %v2307_v5 }
 0x436   :  { %v2166_v53 = vpop.f32.mrf.mxu0  ;;  %v2122_v26 = vpop.f32.mrf.mxu1 }
 0x437   :  { %v4907_v0 = vsel %vm2269_vm3, %v2122_v26, -1e+30  ;;  %v4927_v37 = vsel %vm2269_vm3, %v2166_v53, -1e+30 }
 0x438   :  { %v3940_v10 = vpop.f32.mrf.mxu0  ;;  %v3935_v3 = vpop.f32.mrf.mxu1  ;;  %v2316_v39 = vsel %vm2288_vm4, %v4907_v0, -inf  ;;  %v2319_v31 = vsel %vm2288_vm4, %v4927_v37, -inf }
 0x439   :  { %2311 = vmax.xlane.f32.xlu0 %v2310_v17  ;;  %2317 = vmax.xlane.f32.xlu1 %v2316_v39  ;;  %v1382_v39 = vshrl.u32 %v1349_v2, 16 }
 0x43a   :  { %v2169_v4 = vpop.f32.mrf.mxu0  ;;  %v2213_v28 = vpop.f32.mrf.mxu1 }
 0x43b   :  { %v4919_v12 = vsel %vm2269_vm3, %v2169_v4, -1e+30  ;;  %v4933_v56 = vsel %vm2269_vm3, %v2213_v28, -1e+30 }
 0x43c   :  { %v3941_v55 = vpop.f32.mrf.mxu0  ;;  %v3946_v16 = vpop.f32.mrf.mxu1  ;;  %v2322_v35 = vsel %vm2288_vm4, %v4919_v12, -inf  ;;  %v2325_v36 = vsel %vm2288_vm4, %v4933_v56, -inf }
 0x43d   :  { %2314 = vmax.xlane.f32.xlu0 %v2313_v20  ;;  %2323 = vmax.xlane.f32.xlu1 %v2322_v35  ;;  %v1380_v16 = vpack.i.b16 %v4645_v60, %v1349_v2 }
 0x43e   :  { %v2260_v43 = vpop.f32.mrf.mxu0  ;;  %v2216_v6 = vpop.f32.mrf.mxu1 }
 0x43f   :  { %v4939_v49 = vsel %vm2269_vm3, %v2260_v43, -1e+30  ;;  %v4953_v57 = vsel %vm2269_vm3, %v2216_v6, -1e+30 }
 0x440   :  { %v3952_v50 = vpop.f32.mrf.mxu0  ;;  %v3947_v42 = vpop.f32.mrf.mxu1  ;;  %v2331_v61 = vsel %vm2288_vm4, %v4939_v49, -inf  ;;  %v2328_v58 = vsel %vm2288_vm4, %v4953_v57, -inf }
 0x441   :  { %2320 = vmax.xlane.f32.xlu0 %v2319_v31 }
 0x442   :  { %v2263_v62 = vpop.f32.mrf.mxu0 }
 0x443   :  { %v4945_v22 = vsel %vm2269_vm3, %v2263_v62, -1e+30 }
 0x444   :  { %v3953_v11 = vpop.f32.mrf.mxu0  ;;  %v2334_v8 = vsel %vm2288_vm4, %v4945_v22, -inf }
 0x445   :  { %2326 = vmax.xlane.f32.xlu0 %v2325_v36 }
 0x449   :  { %2332 = vmax.xlane.f32.xlu0 %v2331_v61 }
 0x44d   :  { %2335 = vmax.xlane.f32.xlu0 %v2334_v8 }
 0x44e   :  { %1360 = vrot.lane.b32.xlu1 %v4491_v59, %s4284_s19  ;;  %s4297_s19 = smov 16  }
 0x472   :  { %2329 = vmax.xlane.f32.xlu1 %v2328_v58 }
 0x4ae   :  { %v2291_v29 = vpop.xlane.xlu0 %2290 }
 0x4af   :  { %v2337_v14 = vsub.f32 %v4861_v51, %v2291_v29 }
 0x4b1   :  { %v2353_v33 = vmul.f32 1.442695, %v2337_v14 }
 0x4b2   :  { %v2297_v52 = vpop.xlane.xlu0 %2296  ;;  %v2294_v15 = vpop.xlane.xlu1 %2293 }
 0x4b3   :  { %4069 = vpow2.f32 %v2353_v33  ;;  %v2339_v38 = vsub.f32 %v4867_v19, %v2297_v52  ;;  %v2338_v59 = vsub.f32 %v4871_v23, %v2294_v15 }
 0x4b5   :  { %v2357_v46 = vmul.f32 1.442695, %v2339_v38  ;;  %v2355_v27 = vmul.f32 1.442695, %v2338_v59 }
 0x4b6   :  { %v2300_v44 = vpop.xlane.xlu0 %2299 }
 0x4b7   :  { %4071 = vpow2.f32 %v2357_v46  ;;  %v2340_v63 = vsub.f32 %v4879_v34, %v2300_v44  ;;  %v1383_v34 = vshrl.u32 %v4645_v60, 16  ;;  %v1526_v60 = vcombine.high %v1380_v16, %v4443_v18 }
 0x4b8   :  { %4073 = vpow2.f32 %v2355_v27 }
 0x4b9   :  { %v2359_v47 = vmul.f32 1.442695, %v2340_v63  ;;  %v1384_v6 = vpack.i.b16 %v1383_v34, %v1382_v39  ;;  %v1540_v52 = vrot.slane %v1526_v60, %v4455_v24 }
 0x4ba   :  { %v2303_v13 = vpop.xlane.xlu0 %2302  ;;  %v2306_v5 = vpop.xlane.xlu1 %2305 }
 0x4bb   :  { %4075 = vpow2.f32 %v2359_v47  ;;  %v2341_v51 = vsub.f32 %v4885_v9, %v2303_v13  ;;  %v2342_v53 = vsub.f32 %v4889_v30, %v2306_v5  ;;  %v1592_v2 = vcombine.high %v1384_v6, %v4443_v18 }
 0x4bc   :  { %v1599_v15 = vrot.slane %v1384_v6, %v4455_v24 }
 0x4bd   :  { %v2361_v26 = vmul.f32 1.442695, %v2341_v51  ;;  %v2363_v10 = vmul.f32 1.442695, %v2342_v53  ;;  %v1606_v44 = vrot.slane %v1592_v2, %v4455_v24 }
 0x4be   :  { %v2309_v19 = vpop.xlane.xlu0 %2308 }
 0x4bf   :  { %4077 = vpow2.f32 %v2361_v26  ;;  %v2343_v23 = vsub.f32 %v4897_v40, %v2309_v19 }
 0x4c0   :  { %v4070_v3 = vpop.eup %4069  ;;  %4079 = vpow2.f32 %v2363_v10 }
 0x4c1   :  { %v2385_v17 = vsel %vm2288_vm4, %v4070_v3, 0.0  ;;  %v2365_v55 = vmul.f32 1.442695, %v2343_v23 }
 0x4c2   :  { %v2312_v4 = vpop.xlane.xlu0 %2311  ;;  %v2318_v28 = vpop.xlane.xlu1 %2317  ;;  %2386 = vadd.xlane.f32.xlu0 %v2385_v17 }
 0x4c3   :  { %v2344_v9 = vsub.f32 %v4903_v25, %v2312_v4  ;;  %v2346_v20 = vsub.f32 %v4907_v0, %v2318_v28  ;;  %4081 = vpow2.f32 %v2365_v55 }
 0x4c4   :  { %v4072_v30 = vpop.eup %4071 }
 0x4c5   :  { %v4074_v35 = vpop.eup %4073  ;;  %v2367_v40 = vmul.f32 1.442695, %v2344_v9  ;;  %v2391_v43 = vsel %vm2288_vm4, %v4072_v30, 0.0  ;;  %v2371_v36 = vmul.f32 1.442695, %v2346_v20 }
 0x4c6   :  { %v2315_v50 = vpop.xlane.xlu0 %2314  ;;  %v2324_v42 = vpop.xlane.xlu1 %2323  ;;  %2392 = vadd.xlane.f32.xlu0 %v2391_v43  ;;  %v2388_v31 = vsel %vm2288_vm4, %v4074_v35, 0.0  ;;  %v2449_v62 = vpack.c.bf16 %v4074_v35, %v4070_v3 }
 0x4c7   :  { %v2345_v11 = vsub.f32 %v4915_v48, %v2315_v50  ;;  %2389 = vadd.xlane.f32.xlu1 %v2388_v31  ;;  %v2348_v0 = vsub.f32 %v4919_v12, %v2324_v42  ;;  %4083 = vpow2.f32 %v2367_v40  ;;  %v1533_v48 = vrot.slane %v1380_v16, %v4455_v24 }
 0x4c8   :  { %v4076_v25 = vpop.eup %4075  ;;  %3957 = vmatmul.mubr.msk.bf16.vlgmr.msra.gmra.mxu1 %vm2288_vm4, %v2449_v62  ;;  %v1390_v12 = vshrl.u32 %v4669_v21, 16 }
 0x4c9   :  { %v2369_v61 = vmul.f32 1.442695, %v2345_v11  ;;  %3967 = vmatpush3.bf16.msra.mxu1 %v1868_v7  ;;  %v2394_v8 = vsel %vm2288_vm4, %v4076_v25, 0.0  ;;  %v2450_v58 = vpack.c.bf16 %v4076_v25, %v4072_v30  ;;  %3968 = vmatprep.mubr.msk.bf16.mxu1 %vm4296_vm1, %v4295_v54  ;;  %v2375_v38 = vmul.f32 1.442695, %v2348_v0 }
 0x4ca   :  { %v2321_v29 = vpop.xlane.xlu0 %2320  ;;  %v1361_v14 = vpop.permute.xlu1 %1360  ;;  %3978 = vmatprep.subr.bf16.mxu1 %v4295_v54 }
 0x4cb   :  { %4085 = vpow2.f32 %v2369_v61  ;;  %v2347_v41 = vsub.f32 %v4927_v37, %v2321_v29  ;;  %v1388_v45 = vpack.i.b16 %v1361_v14, %v4669_v21  ;;  %v1391_v7 = vshrl.u32 %v1361_v14, 16  ;;  %2395 = vadd.xlane.f32.xlu1 %v2394_v8  ;;  %3963 = vmatmul.mubr.msk.bf16.vlgmr.msra.gmra.mxu0 %vm2288_vm4, %v2450_v58 }
 0x4cc   :  { %v4078_v33 = vpop.eup %4077  ;;  %4087 = vpow2.f32 %v2371_v36  ;;  %3973 = vmatpush3.bf16.msra.mxu0 %v4826_v1  ;;  %3974 = vmatprep.mubr.msk.bf16.mxu0 %vm4296_vm1, %v4295_v54 }
 0x4cd   :  { %v4080_v59 = vpop.eup %4079  ;;  %v2373_v37 = vmul.f32 1.442695, %v2347_v41  ;;  %v1392_v46 = vpack.i.b16 %v1391_v7, %v1390_v12  ;;  %v1541_v21 = vcombine.high %v1388_v45, %v4443_v18  ;;  %v1548_v27 = vrot.slane %v1388_v45, %v4455_v24  ;;  %3984 = vmatprep.subr.bf16.mxu0 %v4295_v54 }
 0x4ce   :  { %v2397_v63 = vsel %vm2288_vm4, %v4078_v33, 0.0  ;;  %v2327_v47 = vpop.xlane.xlu0 %2326  ;;  %v2400_v13 = vsel %vm2288_vm4, %v4080_v59, 0.0  ;;  %v2451_v1 = vpack.c.bf16 %v4080_v59, %v4078_v33 }
 0x4cf   :  { %4089 = vpow2.f32 %v2373_v37  ;;  %v1555_v5 = vrot.slane %v1541_v21, %v4455_v24  ;;  %v1556_v51 = vcombine.low %v1533_v48, %v1548_v27  ;;  %v1557_v53 = vcombine.high %v1533_v48, %v1548_v27  ;;  %2398 = vadd.xlane.f32.xlu0 %v2397_v63  ;;  %2401 = vadd.xlane.f32.xlu1 %v2400_v13 }
 0x4d0   :  { %4091 = vpow2.f32 %v2375_v38  ;;  %v1607_v26 = vcombine.high %v1392_v46, %v4443_v18  ;;  %v1614_v10 = vrot.slane %v1392_v46, %v4455_v24  ;;  %v2349_v19 = vsub.f32 %v4933_v56, %v2327_v47  ;;  %3969 = vmatmul.mubr.msk.bf16.vlgmr.msra.gmra.mxu1 %vm2288_vm4, %v2451_v1  ;;  %v4082_v35 = vpop.eup %4081 }
 0x4d1   :  { %v1564_v23 = vrot.slane %v1556_v51, %v4468_v32  ;;  %v1571_v3 = vrot.slane %v1557_v53, %v4468_v32  ;;  %v1572_v17 = vcombine.low %v1540_v52, %v1555_v5  ;;  %v1573_v34 = vcombine.high %v1540_v52, %v1555_v5  ;;  %3980 = vmatprep.mubr.msk.bf16.mxu1 %vm4296_vm1, %v4295_v54 }
 0x4d2   :  { %v1621_v39 = vrot.slane %v1607_v26, %v4455_v24  ;;  %v1622_v4 = vcombine.low %v1599_v15, %v1614_v10  ;;  %v1623_v28 = vcombine.high %v1599_v15, %v1614_v10  ;;  %v2377_v55 = vmul.f32 1.442695, %v2349_v19  ;;  %v2333_v9 = vpop.xlane.xlu0 %2332 }
 0x4d3   :  { %v1580_v30 = vrot.slane %v1572_v17, %v4468_v32  ;;  %v1587_v56 = vrot.slane %v1573_v34, %v4468_v32  ;;  %v1758_v16 = vcombine.low %v1564_v23, %v1571_v3  ;;  %v3801_v20 = vcombine.high %v1564_v23, %v1571_v3 }
 0x4d4   :  { %v1630_v40 = vrot.slane %v1622_v4, %v4468_v32  ;;  %v1637_v43 = vrot.slane %v1623_v28, %v4468_v32  ;;  %v1638_v6 = vcombine.low %v1606_v44, %v1621_v39  ;;  %v1639_v50 = vcombine.high %v1606_v44, %v1621_v39  ;;  %v4084_v25 = vpop.eup %4083 }
 0x4d5   :  { %v1765_v42 = vrot.slane %v1758_v16, %v4455_v24  ;;  %v1773_v31 = vrot.slane %v3801_v20, %v4455_v24  ;;  %v1774_v62 = vcombine.low %v1580_v30, %v1587_v56  ;;  %v3802_v11 = vcombine.high %v1580_v30, %v1587_v56 }
 0x4d6   :  { %v1646_v60 = vrot.slane %v1638_v6, %v4468_v32  ;;  %v1653_v36 = vrot.slane %v1639_v50, %v4468_v32  ;;  %v1808_v0 = vcombine.low %v1630_v40, %v1637_v43  ;;  %v3803_v61 = vcombine.high %v1630_v40, %v1637_v43  ;;  %v2336_v8 = vpop.xlane.xlu0 %2335 }
 0x4d7   :  { %v1781_v58 = vrot.slane %v1774_v62, %v4455_v24  ;;  %v1789_v48 = vrot.slane %v3802_v11, %v4455_v24  ;;  %4093 = vpow2.f32 %v2377_v55  ;;  %v2403_v2 = vsel %vm2288_vm4, %v4082_v35, 0.0 }
 0x4d8   :  { %v4086_v12 = vpop.eup %4085  ;;  %v1815_v29 = vrot.slane %v1808_v0, %v4455_v24  ;;  %v1823_v14 = vrot.slane %v3803_v61, %v4455_v24  ;;  %v1824_v41 = vcombine.low %v1646_v60, %v1653_v36  ;;  %v3804_v45 = vcombine.high %v1646_v60, %v1653_v36  ;;  %2404 = vadd.xlane.f32.xlu0 %v2403_v2 }
 0x4d9   :  { %v4088_v7 = vpop.eup %4087  ;;  %v2351_v33 = vsub.f32 %v4939_v49, %v2333_v9  ;;  %v2352_v52 = vsub.f32 %v4945_v22, %v2336_v8  ;;  %v2406_v15 = vsel %vm2288_vm4, %v4084_v25, 0.0  ;;  %v2452_v38 = vpack.c.bf16 %v4084_v25, %v4082_v35 }
 0x4da   :  { %2407 = vadd.xlane.f32.xlu1 %v2406_v15  ;;  %v2409_v59 = vsel %vm2288_vm4, %v4086_v12, 0.0  ;;  %v1790_v37 = vcombine.low %v1765_v42, %v1773_v31  ;;  %v1798_v21 = vcombine.low %v1781_v58, %v1789_v48  ;;  %v1831_v27 = vrot.slane %v1824_v41, %v4455_v24 }
 0x4db   :  { %v2381_v46 = vmul.f32 1.442695, %v2351_v33  ;;  %3975 = vmatmul.mubr.msk.bf16.vlgmr.msra.gmra.mxu0 %vm2288_vm4, %v2452_v38  ;;  %v2412_v63 = vsel %vm2288_vm4, %v4088_v7, 0.0  ;;  %v1839_v49 = vrot.slane %v3804_v45, %v4455_v24  ;;  %v1840_v22 = vcombine.low %v1815_v29, %v1823_v14 }
 0x4dc   :  { %v4090_v44 = vpop.eup %4089  ;;  %2410 = vadd.xlane.f32.xlu0 %v2409_v59  ;;  %v2383_v13 = vmul.f32 1.442695, %v2352_v52  ;;  %v1805_v5 = vrot.slane %v1798_v21, %v4468_v32  ;;  %3986 = vmatprep.mubr.msk.bf16.mxu0 %vm4296_vm1, %v4295_v54  ;;  %v1797_v51 = vrot.slane %v1790_v37, %v4468_v32  ;;  %v2453_v16 = vpack.c.bf16 %v4088_v7, %v4086_v12 }
 0x4dd   :  { %v4092_v47 = vpop.eup %4091  ;;  %4095 = vpow2.f32 %v2381_v46  ;;  %v2415_v1 = vsel %vm2288_vm4, %v4090_v44, 0.0  ;;  %v1848_v53 = vcombine.low %v1831_v27, %v1839_v49  ;;  %v1847_v10 = vrot.slane %v1840_v22, %v4468_v32 }
 0x4de   :  { %2413 = vadd.xlane.f32.xlu1 %v2412_v63  ;;  %v1806_v26 = vcombine.low %v1797_v51, %v1805_v5  ;;  %4097 = vpow2.f32 %v2383_v13  ;;  %v2418_v23 = vsel %vm2288_vm4, %v4092_v47, 0.0  ;;  %v1807_v55 = vcombine.high %v1797_v51, %v1805_v5 }
 0x4df   :  { %v1855_v19 = vrot.slane %v1848_v53, %v4468_v32  ;;  %v2454_v40 = vpack.c.bf16 %v4092_v47, %v4090_v44 }
 0x4e0   :  { %2416 = vadd.xlane.f32.xlu0 %v2415_v1  ;;  %v1878_v4 = vshrl.u32 %v1806_v26, 16  ;;  %v1886_v35 = vshrl.u32 %v1807_v55, 16 }
 0x4e1   :  { %v1856_v3 = vcombine.low %v1847_v10, %v1855_v19  ;;  %v1857_v17 = vcombine.high %v1847_v10, %v1855_v19 }
 0x4e2   :  { %2419 = vadd.xlane.f32.xlu1 %v2418_v23 }
 0x4e3   :  { %v1876_v39 = vpack.i.b16 %v1856_v3, %v1806_v26  ;;  %v1879_v28 = vshrl.u32 %v1856_v3, 16  ;;  %v1887_v56 = vshrl.u32 %v1857_v17, 16  ;;  %v1884_v20 = vpack.i.b16 %v1857_v17, %v1807_v55 }
 0x4e4   :  { %v4094_v34 = vpop.eup %4093 }
 0x4e5   :  { %v2421_v9 = vsel %vm2288_vm4, %v4094_v34, 0.0  ;;  %3979 = vmatpush3.bf16.msra.mxu1 %v1876_v39  ;;  %v1880_v30 = vpack.i.b16 %v1879_v28, %v1878_v4  ;;  %v1888_v6 = vpack.i.b16 %v1887_v56, %v1886_v35 }
 0x4e6   :  { %2422 = vadd.xlane.f32.xlu0 %v2421_v9  ;;  %3990 = vmatprep.subr.bf16.mxu1 %v4295_v54 }
 0x4e7   :  { %3985 = vmatpush3.bf16.msra.mxu0 %v1880_v30 }
 0x4e8   :  { %3981 = vmatmul.mubr.msk.bf16.vlgmr.msra.gmra.mxu1 %vm2288_vm4, %v2453_v16  ;;  %3996 = vmatprep.subr.bf16.mxu0 %v4295_v54 }
 0x4e9   :  { %3991 = vmatpush3.bf16.msra.mxu1 %v1884_v20  ;;  %3992 = vmatprep.mubr.msk.bf16.mxu1 %vm4296_vm1, %v4295_v54 }
 0x4ea   :  { %v4096_v43 = vpop.eup %4095  ;;  %3987 = vmatmul.mubr.msk.bf16.vlgmr.msra.gmra.mxu0 %vm2288_vm4, %v2454_v40 }
 0x4eb   :  { %v2427_v50 = vsel %vm2288_vm4, %v4096_v43, 0.0  ;;  %3997 = vmatpush3.bf16.msra.mxu0 %v1888_v6  ;;  %3998 = vmatprep.mubr.msk.bf16.mxu0 %vm4296_vm1, %v4295_v54  ;;  %v4098_v42 = vpop.eup %4097 }
 0x4ec   :  { %2428 = vadd.xlane.f32.xlu0 %v2427_v50  ;;  %v2456_v31 = vpack.c.bf16 %v4098_v42, %v4096_v43  ;;  %v2430_v61 = vsel %vm2288_vm4, %v4098_v42, 0.0 }
 0x4f2   :  { %3999 = vmatmul.mubr.msk.bf16.vlgmr.msra.gmra.mxu0 %vm2288_vm4, %v2456_v31 }
 0x4fb   :  { %v2330_v62 = vpop.xlane.xlu1 %2329 }
 0x4fc   :  { %v2350_v11 = vsub.f32 %v4953_v57, %v2330_v62 }
 0x4fe   :  { %v2379_v25 = vmul.f32 1.442695, %v2350_v11 }
 0x500   :  { %4099 = vpow2.f32 %v2379_v25 }
 0x50d   :  { %v4100_v60 = vpop.eup %4099 }
 0x50e   :  { %v2424_v36 = vsel %vm2288_vm4, %v4100_v60, 0.0  ;;  %v2455_v0 = vpack.c.bf16 %v4100_v60, %v4094_v34 }
 0x50f   :  { %2425 = vadd.xlane.f32.xlu1 %v2424_v36 }
 0x510   :  { %3993 = vmatmul.mubr.msk.bf16.vlgmr.msra.gmra.mxu1 %vm2288_vm4, %v2455_v0 }
 0x513   :  { %2431 = vadd.xlane.f32.xlu1 %v2430_v61 }
 0x54b   :  { %v2387_v54 = vpop.xlane.xlu0 %2386 }
 0x54f   :  { %v2393_v58 = vpop.xlane.xlu0 %2392 }
 0x550   :  { %v2390_v8 = vpop.xlane.xlu1 %2389 }
 0x554   :  { %v2396_v48 = vpop.xlane.xlu1 %2395 }
 0x555   :  { %4101 = vrcp.f32 %v2396_v48 }
 0x556   :  { %4103 = vrcp.f32 %v2393_v58 }
 0x557   :  { %4105 = vrcp.f32 %v2390_v8 }
 0x558   :  { %v2399_v2 = vpop.xlane.xlu0 %2398  ;;  %v2402_v29 = vpop.xlane.xlu1 %2401  ;;  %4107 = vrcp.f32 %v2387_v54 }
 0x559   :  { %4109 = vrcp.f32 %v2402_v29 }
 0x55a   :  { %4111 = vrcp.f32 %v2399_v2 }
 0x561   :  { %v2405_v7 = vpop.xlane.xlu0 %2404 }
 0x562   :  { %4113 = vrcp.f32 %v2405_v7  ;;  %v4102_v21 = vpop.eup %4101 }
 0x563   :  { %v2408_v52 = vpop.xlane.xlu1 %2407  ;;  %v4104_v44 = vpop.eup %4103 }
 0x564   :  { %4115 = vrcp.f32 %v2408_v52  ;;  %v4106_v49 = vpop.eup %4105 }
 0x565   :  { %v4108_v13 = vpop.eup %4107 }
 0x566   :  { %v4110_v1 = vpop.eup %4109 }
 0x567   :  { %v4112_v10 = vpop.eup %4111 }
 0x56f   :  { %v4114_v3 = vpop.eup %4113 }
 0x571   :  { %v4116_v34 = vpop.eup %4115 }
 0x588   :  { %v2494_v12 = vpop.f32.mrf.mxu1 }
 0x589   :  { %v2809_v5 = vmul.f32 %v4108_v13, %v2494_v12 }
 0x58a   :  { %v3958_v57 = vpop.f32.mrf.mxu1 }
 0x58b   :  { %v2538_v14 = vpop.f32.mrf.mxu0 }
 0x58c   :  { %v2497_v41 = vpop.f32.mrf.mxu1  ;;  %v2811_v47 = vmul.f32 %v4104_v44, %v2538_v14 }
 0x58d   :  { %v3964_v45 = vpop.f32.mrf.mxu0  ;;  %v2810_v22 = vmul.f32 %v4106_v49, %v2497_v41 }
 0x58e   :  { %v3959_v33 = vpop.f32.mrf.mxu1 }
 0x58f   :  { %v2541_v15 = vpop.f32.mrf.mxu0  ;;  %v2825_v19 = vpack.c.bf16 %v2810_v22, %v2809_v5 }
 0x590   :  { %v2582_v38 = vpop.f32.mrf.mxu1  ;;  %v2812_v63 = vmul.f32 %v4102_v21, %v2541_v15 }
 0x591   :  { %v3965_v59 = vpop.f32.mrf.mxu0  ;;  %v2813_v17 = vmul.f32 %v4112_v10, %v2582_v38  ;;  %v2837_v56 = vshrl.u32 %v2825_v19, 16  ;;  %v2411_v10 = vpop.xlane.xlu0 %2410 }
 0x592   :  { %v3970_v37 = vpop.f32.mrf.mxu1  ;;  %v2826_v51 = vpack.c.bf16 %v2812_v63, %v2811_v47 }
 0x594   :  { %v2585_v46 = vpop.f32.mrf.mxu1  ;;  %v2835_v39 = vpack.i.b16 %v2826_v51, %v2825_v19  ;;  %v2838_v4 = vshrl.u32 %v2826_v51, 16  ;;  %v2414_v19 = vpop.xlane.xlu1 %2413 }
 0x595   :  { %v2814_v26 = vmul.f32 %v4110_v1, %v2585_v46 }
 0x596   :  { %v3971_v27 = vpop.f32.mrf.mxu1  ;;  %v2839_v35 = vpack.i.b16 %v2838_v4, %v2837_v56  ;;  %v2865_v40 = vcombine.high %v2835_v39, %v4443_v18  ;;  %v2872_v42 = vrot.slane %v2835_v39, %v4455_v24 }
 0x597   :  { %v2827_v55 = vpack.c.bf16 %v2814_v26, %v2813_v17 }
 0x598   :  { %v2879_v25 = vrot.slane %v2865_v40, %v4455_v24  ;;  %v2931_v60 = vcombine.high %v2839_v35, %v4443_v18  ;;  %v2938_v8 = vrot.slane %v2839_v35, %v4455_v24 }
 0x599   :  { %v2845_v43 = vshrl.u32 %v2827_v55, 16 }
 0x59a   :  { %v2945_v14 = vrot.slane %v2931_v60, %v4455_v24 }
 0x59b   :  { %v2626_v53 = vpop.f32.mrf.mxu0 }
 0x59c   :  { %v2815_v9 = vmul.f32 %v4114_v3, %v2626_v53 }
 0x59d   :  { %v3976_v23 = vpop.f32.mrf.mxu0 }
 0x59f   :  { %v2629_v28 = vpop.f32.mrf.mxu0 }
 0x5a0   :  { %v2816_v30 = vmul.f32 %v4116_v34, %v2629_v28 }
 0x5a1   :  { %v3977_v16 = vpop.f32.mrf.mxu0 }
 0x5a2   :  { %v2828_v20 = vpack.c.bf16 %v2816_v30, %v2815_v9 }
 0x5a4   :  { %v2843_v6 = vpack.i.b16 %v2828_v20, %v2827_v55  ;;  %v2846_v50 = vshrl.u32 %v2828_v20, 16 }
 0x5a6   :  { %v2847_v31 = vpack.i.b16 %v2846_v50, %v2845_v43  ;;  %v2880_v62 = vcombine.high %v2843_v6, %v4443_v18  ;;  %v2887_v11 = vrot.slane %v2843_v6, %v4455_v24  ;;  %v2417_v50 = vpop.xlane.xlu0 %2416 }
 0x5a8   :  { %v2894_v36 = vrot.slane %v2880_v62, %v4455_v24  ;;  %v2895_v0 = vcombine.low %v2872_v42, %v2887_v11  ;;  %v2896_v61 = vcombine.high %v2872_v42, %v2887_v11  ;;  %v2946_v54 = vcombine.high %v2847_v31, %v4443_v18  ;;  %v5063_v48 = vpop.f32.mrf.mxu1  ;;  %v2420_v42 = vpop.xlane.xlu1 %2419 }
 0x5a9   :  { %v2953_v58 = vrot.slane %v2847_v31, %v4455_v24  ;;  %4117 = vrcp.f32 %v2420_v42 }
 0x5aa   :  { %v2903_v2 = vrot.slane %v2895_v0, %v4468_v32  ;;  %v2910_v12 = vrot.slane %v2896_v61, %v4468_v32  ;;  %v2911_v57 = vcombine.low %v2879_v25, %v2894_v36  ;;  %v2912_v29 = vcombine.high %v2879_v25, %v2894_v36  ;;  %v3982_v33 = vpop.f32.mrf.mxu1  ;;  %v5069_v52 = vpop.f32.mrf.mxu0 }
 0x5ab   :  { %v2960_v41 = vrot.slane %v2946_v54, %v4455_v24  ;;  %v2961_v45 = vcombine.low %v2938_v8, %v2953_v58  ;;  %v2962_v7 = vcombine.high %v2938_v8, %v2953_v58  ;;  %4119 = vrcp.f32 %v2414_v19 }
 0x5ac   :  { %v2919_v15 = vrot.slane %v2911_v57, %v4468_v32  ;;  %v2926_v38 = vrot.slane %v2912_v29, %v4468_v32  ;;  %v3129_v59 = vcombine.low %v2903_v2, %v2910_v12  ;;  %v3821_v37 = vcombine.high %v2903_v2, %v2910_v12  ;;  %v5075_v63 = vpop.f32.mrf.mxu1  ;;  %v3988_v49 = vpop.f32.mrf.mxu0 }
 0x5ad   :  { %v2969_v46 = vrot.slane %v2961_v45, %v4468_v32  ;;  %v2976_v21 = vrot.slane %v2962_v7, %v4468_v32  ;;  %v2977_v27 = vcombine.low %v2945_v14, %v2960_v41  ;;  %v2978_v44 = vcombine.high %v2945_v14, %v2960_v41  ;;  %v2426_v61 = vpop.xlane.xlu1 %2425  ;;  %v2423_v2 = vpop.xlane.xlu0 %2422 }
 0x5ae   :  { %v3136_v22 = vrot.slane %v3129_v59, %v4455_v24  ;;  %v3144_v47 = vrot.slane %v3821_v37, %v4455_v24  ;;  %v3983_v5 = vpop.f32.mrf.mxu1  ;;  %v2717_v51 = vpop.f32.mrf.mxu0  ;;  %v3145_v53 = vcombine.low %v2919_v15, %v2926_v38  ;;  %v3822_v26 = vcombine.high %v2919_v15, %v2926_v38 }
 0x5af   :  { %v2985_v13 = vrot.slane %v2977_v27, %v4468_v32  ;;  %v2992_v1 = vrot.slane %v2978_v44, %v4468_v32  ;;  %v3179_v23 = vcombine.low %v2969_v46, %v2976_v21  ;;  %v3823_v39 = vcombine.high %v2969_v46, %v2976_v21 }
 0x5b0   :  { %v3989_v3 = vpop.f32.mrf.mxu0  ;;  %v3152_v17 = vrot.slane %v3145_v53, %v4455_v24  ;;  %v3160_v34 = vrot.slane %v3822_v26, %v4455_v24  ;;  %v3161_v28 = vcombine.low %v3136_v22, %v3144_v47  ;;  %4121 = vrcp.f32 %v2417_v50 }
 0x5b1   :  { %v3195_v4 = vcombine.low %v2985_v13, %v2992_v1  ;;  %v3186_v55 = vrot.slane %v3179_v23, %v4455_v24  ;;  %v3194_v56 = vrot.slane %v3823_v39, %v4455_v24  ;;  %v3824_v20 = vcombine.high %v2985_v13, %v2992_v1  ;;  %v2432_v7 = vpop.xlane.xlu1 %2431  ;;  %v2429_v15 = vpop.xlane.xlu0 %2428 }
 0x5b2   :  { %v5084_v9 = vpop.f32.mrf.mxu0  ;;  %v3169_v30 = vcombine.low %v3152_v17, %v3160_v34  ;;  %v3168_v62 = vrot.slane %v3161_v28, %v4468_v32  ;;  %4123 = vrcp.f32 %v2411_v10 }
 0x5b3   :  { %v3202_v16 = vrot.slane %v3195_v4, %v4455_v24  ;;  %v3210_v43 = vrot.slane %v3824_v20, %v4455_v24  ;;  %v3211_v6 = vcombine.low %v3186_v55, %v3194_v56  ;;  %4125 = vrcp.f32 %v2432_v7 }
 0x5b4   :  { %v4000_v35 = vpop.f32.mrf.mxu0  ;;  %v3176_v40 = vrot.slane %v3169_v30, %v4468_v32  ;;  %4127 = vrcp.f32 %v2429_v15 }
 0x5b5   :  { %v3219_v11 = vcombine.low %v3202_v16, %v3210_v43  ;;  %v3218_v60 = vrot.slane %v3211_v6, %v4468_v32  ;;  %4129 = vrcp.f32 %v2423_v2 }
 0x5b6   :  { %v2805_v31 = vpop.f32.mrf.mxu0  ;;  %v5093_v0 = vcombine.low %v3168_v62, %v3176_v40  ;;  %v3178_v54 = vcombine.high %v3168_v62, %v3176_v40  ;;  %4131 = vrcp.f32 %v2426_v61  ;;  %v4118_v59 = vpop.eup %4117 }
 0x5b7   :  { %v3226_v36 = vrot.slane %v3219_v11, %v4468_v32  ;;  %v2820_v46 = vmul.f32 %v4118_v59, %v2717_v51 }
 0x5b8   :  { %v4001_v25 = vpop.f32.mrf.mxu0  ;;  %v3332_v57 = vshrl.u32 %v5093_v0, 16  ;;  %v3338_v33 = vshrl.u32 %v3178_v54, 16  ;;  %v4120_v37 = vpop.eup %4119 }
 0x5b9   :  { %v3228_v8 = vcombine.high %v3218_v60, %v3226_v36  ;;  %v5095_v58 = vcombine.low %v3218_v60, %v3226_v36  ;;  %v2818_v44 = vmul.f32 %v4120_v37, %v5075_v63 }
 0x5bb   :  { %v3337_v12 = vpack.i.b16 %v3228_v8, %v3178_v54  ;;  %v3333_v29 = vshrl.u32 %v5095_v58, 16  ;;  %v3331_v14 = vpack.i.b16 %v5095_v58, %v5093_v0  ;;  %v3339_v45 = vshrl.u32 %v3228_v8, 16  ;;  %v3829_v58 = vld [vmem:[%s5226_s6] ss:$0 sm:$0xff] }
 0x5bd   :  { %3357 = vrot.lane.b32.xlu1 %v3337_v12, %s4297_s19  ;;  %v3334_v41 = vpack.i.b16 %v3333_v29, %v3332_v57  ;;  %v3340_v38 = vpack.i.b16 %v3339_v45, %v3338_v33  ;;  %v4122_v21 = vpop.eup %4121 }
 0x5be   :  { %v2819_v27 = vmul.f32 %v4122_v21, %v5069_v52 }
 0x5bf   :  { %3353 = vrot.lane.b32.xlu0 %v3334_v41, %s4298_s5  ;;  %v4124_v49 = vpop.eup %4123 }
 0x5c0   :  { %v4126_v22 = vpop.eup %4125  ;;  %v2817_v47 = vmul.f32 %v4124_v49, %v5063_v48  ;;  %v2830_v13 = vpack.c.bf16 %v2820_v46, %v2819_v27 }
 0x5c1   :  { %v2824_v5 = vmul.f32 %v4126_v22, %v2805_v31  ;;  %v4128_v53 = vpop.eup %4127 }
 0x5c2   :  { %v2829_v26 = vpack.c.bf16 %v2818_v44, %v2817_v47  ;;  %v4130_v19 = vpop.eup %4129  ;;  %v2823_v23 = vmul.f32 %v4128_v53, %v5084_v9  ;;  %v2854_v17 = vshrl.u32 %v2830_v13, 16 }
 0x5c3   :  { %3361 = vrot.lane.b32.xlu0 %v3340_v38, %s4299_s16  ;;  %v4132_v3 = vpop.eup %4131 }
 0x5c4   :  { %v2851_v51 = vpack.i.b16 %v2830_v13, %v2829_v26  ;;  %v2832_v52 = vpack.c.bf16 %v2824_v5, %v2823_v23  ;;  %v2853_v4 = vshrl.u32 %v2829_v26, 16  ;;  %v4053_v13 = vld [vmem:[#allocation2 + $0x8] sm:$0xff]  }
 0x5c5   :  { %4002 = vmatprep.subr.bf16.mxu1 %v4053_v13 }
 0x5c6   :  { %v2855_v48 = vpack.i.b16 %v2854_v17, %v2853_v4  ;;  %v2997_v30 = vcombine.high %v2851_v51, %v4443_v18  ;;  %v2862_v56 = vshrl.u32 %v2832_v52, 16  ;;  %v3004_v35 = vrot.slane %v2851_v51, %v4455_v24  ;;  %4003 = vmatpush3.bf16.msra.mxu1 %v4053_v13 }
 0x5c8   :  { %v3011_v6 = vrot.slane %v2997_v30, %v4455_v24  ;;  %v3063_v50 = vcombine.high %v2855_v48, %v4443_v18  ;;  %v3070_v25 = vrot.slane %v2855_v48, %v4455_v24 }
 0x5ca   :  { %v3077_v2 = vrot.slane %v3063_v50, %v4455_v24 }
 0x5d0   :  { %v2758_v1 = vpop.f32.mrf.mxu1 }
 0x5d1   :  { %v2821_v39 = vmul.f32 %v4130_v19, %v2758_v1 }
 0x5d2   :  { %v3994_v10 = vpop.f32.mrf.mxu1 }
 0x5d4   :  { %v2761_v34 = vpop.f32.mrf.mxu1 }
 0x5d5   :  { %v2822_v63 = vmul.f32 %v4132_v3, %v2761_v34 }
 0x5d6   :  { %v3995_v28 = vpop.f32.mrf.mxu1 }
 0x5d7   :  { %v2831_v55 = vpack.c.bf16 %v2822_v63, %v2821_v39 }
 0x5d9   :  { %v2859_v16 = vpack.i.b16 %v2832_v52, %v2831_v55  ;;  %v2861_v20 = vshrl.u32 %v2831_v55, 16  ;;  %v4054_v52 = vld [vmem:[#allocation2] sm:$0xff]  }
 0x5da   :  { %4004 = vmatprep.subr.bf16.mxu1 %v4054_v52 }
 0x5db   :  { %v2863_v40 = vpack.i.b16 %v2862_v56, %v2861_v20  ;;  %v3012_v9 = vcombine.high %v2859_v16, %v4443_v18  ;;  %v3019_v43 = vrot.slane %v2859_v16, %v4455_v24  ;;  %4005 = vmatpush3.bf16.msra.mxu1 %v4054_v52 }
 0x5dd   :  { %v3026_v42 = vrot.slane %v3012_v9, %v4455_v24  ;;  %v3027_v31 = vcombine.low %v3004_v35, %v3019_v43  ;;  %v3028_v62 = vcombine.high %v3004_v35, %v3019_v43  ;;  %v3078_v11 = vcombine.high %v2863_v40, %v4443_v18 }
 0x5de   :  { %v3085_v60 = vrot.slane %v2863_v40, %v4455_v24 }
 0x5df   :  { %v3035_v36 = vrot.slane %v3027_v31, %v4468_v32  ;;  %v3042_v61 = vrot.slane %v3028_v62, %v4468_v32  ;;  %v3043_v54 = vcombine.low %v3011_v6, %v3026_v42  ;;  %v3044_v8 = vcombine.high %v3011_v6, %v3026_v42 }
 0x5e0   :  { %v3092_v12 = vrot.slane %v3078_v11, %v4455_v24  ;;  %v3093_v57 = vcombine.low %v3070_v25, %v3085_v60  ;;  %v3094_v29 = vcombine.high %v3070_v25, %v3085_v60 }
 0x5e1   :  { %v3051_v41 = vrot.slane %v3043_v54, %v4468_v32  ;;  %v3058_v18 = vrot.slane %v3044_v8, %v4468_v32  ;;  %v3229_v45 = vcombine.low %v3035_v36, %v3042_v61  ;;  %v3825_v7 = vcombine.high %v3035_v36, %v3042_v61 }
 0x5e2   :  { %v3101_v33 = vrot.slane %v3093_v57, %v4468_v32  ;;  %v3108_v15 = vrot.slane %v3094_v29, %v4468_v32  ;;  %v3109_v38 = vcombine.low %v3077_v2, %v3092_v12  ;;  %v3110_v59 = vcombine.high %v3077_v2, %v3092_v12 }
 0x5e3   :  { %v3236_v37 = vrot.slane %v3229_v45, %v4455_v24  ;;  %v3244_v46 = vrot.slane %v3825_v7, %v4455_v24  ;;  %v3245_v21 = vcombine.low %v3051_v41, %v3058_v18  ;;  %v3826_v27 = vcombine.high %v3051_v41, %v3058_v18  ;;  %v4149_v41 = vld [vmem:[%s5220_s0] sm:$0xff]  ;;  %v4150_v7 = vld [vmem:[%s5220_s0 + $0x10] sm:$0xff] }
 0x5e4   :  { %v3117_v44 = vrot.slane %v3109_v38, %v4468_v32  ;;  %v3124_v49 = vrot.slane %v3110_v59, %v4468_v32  ;;  %v3279_v22 = vcombine.low %v3101_v33, %v3108_v15  ;;  %v3827_v47 = vcombine.high %v3101_v33, %v3108_v15 }
 0x5e5   :  { %v3252_v1 = vrot.slane %v3245_v21, %v4455_v24  ;;  %v3260_v5 = vrot.slane %v3826_v27, %v4455_v24  ;;  %v3261_v3 = vcombine.low %v3236_v37, %v3244_v46  ;;  %v4151_v37 = vld [vmem:[%s5220_s0 + $0x8] sm:$0xff]  ;;  %v4152_v21 = vld [vmem:[%s5220_s0 + $0x18] sm:$0xff] }
 0x5e6   :  { %v3286_v53 = vrot.slane %v3279_v22, %v4455_v24  ;;  %v3294_v26 = vrot.slane %v3827_v47, %v4455_v24  ;;  %v3295_v10 = vcombine.low %v3117_v44, %v3124_v49  ;;  %v3828_v19 = vcombine.high %v3117_v44, %v3124_v49 }
 0x5e7   :  { %v3269_v23 = vcombine.low %v3252_v1, %v3260_v5  ;;  %v3268_v4 = vrot.slane %v3261_v3, %v4468_v32 }
 0x5e8   :  { %v3302_v51 = vrot.slane %v3295_v10, %v4455_v24  ;;  %v3310_v17 = vrot.slane %v3828_v19, %v4455_v24  ;;  %v3311_v34 = vcombine.low %v3286_v53, %v3294_v26 }
 0x5e9   :  { %v3276_v39 = vrot.slane %v3269_v23, %v4468_v32 }
 0x5ea   :  { %v3319_v63 = vcombine.low %v3302_v51, %v3310_v17  ;;  %v3318_v28 = vrot.slane %v3311_v34, %v4468_v32 }
 0x5eb   :  { %v3278_v48 = vcombine.high %v3268_v4, %v3276_v39  ;;  %v3277_v56 = vcombine.low %v3268_v4, %v3276_v39 }
 0x5ec   :  { %v3326_v55 = vrot.slane %v3319_v63, %v4468_v32 }
 0x5ed   :  { %v3344_v40 = vshrl.u32 %v3277_v56, 16  ;;  %v3350_v6 = vshrl.u32 %v3278_v48, 16 }
 0x5ee   :  { %v3328_v30 = vcombine.high %v3318_v28, %v3326_v55  ;;  %v3327_v16 = vcombine.low %v3318_v28, %v3326_v55 }
 0x5f0   :  { %v3349_v20 = vpack.i.b16 %v3328_v30, %v3278_v48  ;;  %v3345_v35 = vshrl.u32 %v3327_v16, 16  ;;  %v3343_v24 = vpack.i.b16 %v3327_v16, %v3277_v56  ;;  %v3351_v43 = vshrl.u32 %v3328_v30, 16  ;;  %v4055_v30 = vld [vmem:[#allocation8 + $0x8] sm:$0xff]   ;;  %v4056_v56 = vld [vmem:[#allocation8] sm:$0xff]  }
 0x5f1   :  { %4010 = vmatprep.subr.bf16.mxu0 %v4055_v30 }
 0x5f2   :  { %3359 = vrot.lane.b32.xlu1 %v3349_v20, %s4297_s19  ;;  %v3346_v9 = vpack.i.b16 %v3345_v35, %v3344_v40  ;;  %v3352_v50 = vpack.i.b16 %v3351_v43, %v3350_v6  ;;  %4011 = vmatpush3.bf16.msra.mxu0 %v4055_v30 }
 0x5f3   :  { %4012 = vmatprep.subr.bf16.mxu0 %v4056_v56 }
 0x5f6   :  { %3355 = vrot.lane.b32.xlu1 %v3346_v9, %s4298_s5  ;;  %4013 = vmatpush3.bf16.msra.mxu0 %v4056_v56 }
 0x5fa   :  { %3363 = vrot.lane.b32.xlu1 %v3352_v50, %s4299_s16 }
 0x62f   :  { %v3358_v31 = vpop.permute.xlu1 %3357 }
 0x631   :  { %v3354_v32 = vpop.permute.xlu0 %3353 }
 0x632   :  { %v3367_v42 = vsel %vm1890_vm2, %v3331_v14, %v3354_v32 }
 0x633   :  { %v3372_v11 = vsel %vm2288_vm4, %v3367_v42, %v3358_v31 }
 0x635   :  { %v3362_v62 = vpop.permute.xlu0 %3361 }
 0x636   :  { %v3377_v25 = vsel %vm3375_vm5, %v3372_v11, %v3362_v62 }
 0x637   :  { %4006 = vmatprep.mubr.msk.bf16.mxu1 %vm112_vm0, %v3377_v25  ;;  %v3834_v25 = vld [vmem:[#allocation5] ss:$0 sm:$0xff] }
 0x664   :  { %v3360_v60 = vpop.permute.xlu1 %3359 }
 0x668   :  { %v3356_v36 = vpop.permute.xlu1 %3355 }
 0x669   :  { %v3370_v61 = vsel %vm1890_vm2, %v3343_v24, %v3356_v36 }
 0x66a   :  { %v3374_v8 = vsel %vm2288_vm4, %v3370_v61, %v3360_v60 }
 0x66c   :  { %v3364_v54 = vpop.permute.xlu1 %3363 }
 0x66d   :  { %v3379_v2 = vsel %vm3375_vm5, %v3374_v8, %v3364_v54 }
 0x66e   :  { %4007 = vmatmul.mubr.msk.bf16.vlgmr.msra.gmra.mxu1 %vm112_vm0, %v3379_v2  ;;  %v3835_v2 = vld [vmem:[#allocation7] ss:$0 sm:$0xff] }
 0x72e   :  { %v4008_v0 = vpop.f32.mrf.mxu1 }
 0x72f   :  { %v3450_v12 = vadd.f32 %v4008_v0, %v3829_v58 }
 0x730   :  { %v3441_v14 = vpop.f32.mrf.mxu1 }
 0x731   :  { %v3442_v57 = vadd.f32 %v3829_v58, %v3441_v14  ;;  %v5163_v33 = vadd.f32 %v4150_v7, %v3450_v12 }
 0x732   :  { %v4009_v29 = vpop.f32.mrf.mxu1 }
 0x733   :  { %v5158_v18 = vadd.f32 %v4149_v41, %v3442_v57  ;;  %v3453_v15 = vadd.f32 %v4009_v29, %v3829_v58  ;;  %v3466_v49 = vsel %vm112_vm0, %v5163_v33, 0.0 }
 0x734   :  { %v3444_v45 = vpop.f32.mrf.mxu1 }
 0x735   :  { %v3445_v38 = vadd.f32 %v3829_v58, %v3444_v45  ;;  %v3460_v59 = vsel %vm112_vm0, %v5158_v18, 0.0  ;;  %v5175_v27 = vadd.f32 %v4152_v21, %v3453_v15  ;;  %v4059_v21 = vld [vmem:[%s5231_s11 + $0x8] sm:$0xff]  }
 0x736   :  { %3461 = vadd.xlane.f32.xlu0 %v3460_v59  ;;  %v4057_v59 = vld [vmem:[%s5231_s11 + $0x18] sm:$0xff]  }
 0x737   :  { %v5170_v46 = vadd.f32 %v4151_v37, %v3445_v38  ;;  %v3469_v22 = vsel %vm112_vm0, %v5175_v27, 0.0  ;;  %v4058_v37 = vld [vmem:[%s5231_s11 + $0x10] sm:$0xff]   ;;  %4018 = vmatprep.subr.bf16.mxu1 %v4057_v59 }
 0x738   :  { %4019 = vmatpush3.bf16.msra.mxu1 %v4057_v59 }
 0x739   :  { %v3463_v44 = vsel %vm112_vm0, %v5170_v46, 0.0  ;;  %4020 = vmatprep.subr.bf16.mxu1 %v4058_v37 }
 0x73a   :  { %3464 = vadd.xlane.f32.xlu1 %v3463_v44  ;;  %3467 = vadd.xlane.f32.xlu0 %v3466_v49  ;;  %v4060_v44 = vld [vmem:[%s5231_s11] sm:$0xff]  }
 0x73b   :  { %v3836_v49 = vld [vmem:[#allocation10] ss:$0 sm:$0xff] }
 0x73c   :  { %4021 = vmatpush3.bf16.msra.mxu1 %v4058_v37 }
 0x73d   :  { %4022 = vmatprep.subr.bf16.mxu1 %v4059_v21 }
 0x73e   :  { %3470 = vadd.xlane.f32.xlu0 %v3469_v22 }
 0x740   :  { %4023 = vmatpush3.bf16.msra.mxu1 %v4059_v21 }
 0x741   :  { %4024 = vmatprep.subr.bf16.mxu1 %v4060_v44 }
 0x744   :  { %4025 = vmatpush3.bf16.msra.mxu1 %v4060_v44 }
 0x7bf   :  { %v3462_v47 = vpop.xlane.xlu0 %3461 }
 0x7c0   :  { %v3472_v13 = vmul.f32 0.03125, %v3462_v47 }
 0x7c2   :  { %v3476_v1 = vsub.f32 %v5158_v18, %v3472_v13 }
 0x7c3   :  { %v3465_v5 = vpop.xlane.xlu1 %3464  ;;  %v3468_v53 = vpop.xlane.xlu0 %3467 }
 0x7c4   :  { %v3473_v26 = vmul.f32 0.03125, %v3465_v5  ;;  %v3474_v10 = vmul.f32 0.03125, %v3468_v53  ;;  %v3480_v19 = vmul.f32 %v3476_v1, %v3476_v1 }
 0x7c6   :  { %v3477_v23 = vsub.f32 %v5170_v46, %v3473_v26  ;;  %v3478_v3 = vsub.f32 %v5163_v33, %v3474_v10  ;;  %v3484_v51 = vsel %vm112_vm0, %v3480_v19, 0.0 }
 0x7c7   :  { %3485 = vadd.xlane.f32.xlu0 %v3484_v51  ;;  %v3471_v17 = vpop.xlane.xlu0 %3470 }
 0x7c8   :  { %v3475_v34 = vmul.f32 0.03125, %v3471_v17  ;;  %v3481_v52 = vmul.f32 %v3477_v23, %v3477_v23  ;;  %v3482_v39 = vmul.f32 %v3478_v3, %v3478_v3 }
 0x7ca   :  { %v3479_v63 = vsub.f32 %v5175_v27, %v3475_v34  ;;  %v3487_v4 = vsel %vm112_vm0, %v3481_v52, 0.0  ;;  %v3490_v28 = vsel %vm112_vm0, %v3482_v39, 0.0 }
 0x7cb   :  { %3488 = vadd.xlane.f32.xlu1 %v3487_v4  ;;  %3491 = vadd.xlane.f32.xlu0 %v3490_v28 }
 0x7cc   :  { %v3483_v55 = vmul.f32 %v3479_v63, %v3479_v63 }
 0x7ce   :  { %v3493_v48 = vsel %vm112_vm0, %v3483_v55, 0.0 }
 0x7cf   :  { %3494 = vadd.xlane.f32.xlu1 %v3493_v48 }
 0x850   :  { %v3486_v16 = vpop.xlane.xlu0 %3485 }
 0x851   :  { %v3496_v20 = vmul.f32 0.03125, %v3486_v16 }
 0x853   :  { %v3500_v35 = vadd.f32 1e-05, %v3496_v20 }
 0x854   :  { %v3489_v24 = vpop.xlane.xlu1 %3488  ;;  %v3492_v40 = vpop.xlane.xlu0 %3491 }
 0x855   :  { %4133 = vrsqrt.f32 %v3500_v35  ;;  %v3497_v9 = vmul.f32 0.03125, %v3489_v24  ;;  %v3498_v43 = vmul.f32 0.03125, %v3492_v40 }
 0x857   :  { %v3501_v6 = vadd.f32 1e-05, %v3497_v9  ;;  %v3502_v50 = vadd.f32 1e-05, %v3498_v43 }
 0x858   :  { %v3495_v32 = vpop.xlane.xlu1 %3494 }
 0x859   :  { %4135 = vrsqrt.f32 %v3501_v6  ;;  %v3499_v42 = vmul.f32 0.03125, %v3495_v32 }
 0x85a   :  { %4137 = vrsqrt.f32 %v3502_v50 }
 0x85b   :  { %v3503_v31 = vadd.f32 1e-05, %v3499_v42 }
 0x85d   :  { %4139 = vrsqrt.f32 %v3503_v31 }
 0x862   :  { %v4134_v62 = vpop.eup %4133 }
 0x863   :  { %v3508_v11 = vmul.f32 %v4134_v62, %v3476_v1 }
 0x865   :  { %v3519_v54 = vmul.f32 %v3834_v25, %v3508_v11 }
 0x866   :  { %v4136_v60 = vpop.eup %4135 }
 0x867   :  { %v4138_v36 = vpop.eup %4137  ;;  %v3509_v61 = vmul.f32 %v4136_v60, %v3477_v23  ;;  %v3530_v12 = vadd.f32 %v3835_v2, %v3519_v54 }
 0x868   :  { %v3510_v8 = vmul.f32 %v4138_v36, %v3478_v3 }
 0x869   :  { %v3520_v0 = vmul.f32 %v3834_v25, %v3509_v61 }
 0x86a   :  { %v4140_v58 = vpop.eup %4139  ;;  %v3521_v29 = vmul.f32 %v3834_v25, %v3510_v8 }
 0x86b   :  { %v3511_v14 = vmul.f32 %v4140_v58, %v3479_v63  ;;  %v3531_v57 = vadd.f32 %v3835_v2, %v3520_v0 }
 0x86c   :  { %v3532_v7 = vadd.f32 %v3835_v2, %v3521_v29 }
 0x86d   :  { %v3534_v41 = vpack.c.bf16 %v3531_v57, %v3530_v12  ;;  %v3522_v45 = vmul.f32 %v3834_v25, %v3511_v14  ;;  %v3841_v14 = vld [vmem:[%s5232_s12] ss:$0 sm:$0xff]  ;;  %s4253_s12 = scalar_lea.vmem %s3761_s2, 512 }
 0x86e   :  { %p4254_p11 = scmp.ne.s32.totalorder %s3761_s2, %s4253_s12  ;;  %p4259_p13 = scmp.lt.s32.totalorder %s4253_s12, %s4253_s12 }
 0x86f   :  { %4014 = vmatprep.mubr.msk.bf16.mxu0 %vm112_vm0, %v3534_v41  ;;  %v3533_v15 = vadd.f32 %v3835_v2, %v3522_v45 }
 0x870   :  { %p4260_p0 = por %p4259_p13, %p4258_p12 }
 0x871   :  { %v3535_v38 = vpack.c.bf16 %v3533_v15, %v3532_v7 }
 0x872   :  { %p4261_p1 = pnand %p4260_p0, %p4254_p11 }
 0x873   :  { %4015 = vmatmul.mubr.msk.bf16.vlgmr.msra.gmra.mxu0 %vm112_vm0, %v3535_v38 }
 0x933   :  { %v4016_v22 = vpop.f32.mrf.mxu0 }
 0x934   :  { %v3608_v47 = vadd.f32 %v4016_v22, %v3836_v49 }
 0x935   :  { %v3599_v13 = vpop.f32.mrf.mxu0 }
 0x936   :  { %v3620_v1 = vmul.f32 0.044715, %v3608_v47  ;;  %v3600_v5 = vadd.f32 %v3836_v49, %v3599_v13  ;;  %v3616_v36 = vmul.f32 0.5, %v3608_v47 }
 0x937   :  { %v4017_v53 = vpop.f32.mrf.mxu0 }
 0x938   :  { %v3624_v26 = vmul.f32 %v3620_v1, %v3608_v47  ;;  %v3618_v10 = vmul.f32 0.044715, %v3600_v5  ;;  %v3611_v19 = vadd.f32 %v4017_v53, %v3836_v49  ;;  %v3614_v11 = vmul.f32 0.5, %v3600_v5 }
 0x939   :  { %v3602_v23 = vpop.f32.mrf.mxu0 }
 0x93a   :  { %v3628_v3 = vmul.f32 %v3624_v26, %v3608_v47  ;;  %v3622_v51 = vmul.f32 %v3618_v10, %v3600_v5  ;;  %v3621_v17 = vmul.f32 0.044715, %v3611_v19  ;;  %v3603_v34 = vadd.f32 %v3836_v49, %v3602_v23 }
 0x93b   :  { %v3617_v31 = vmul.f32 0.5, %v3611_v19 }
 0x93c   :  { %v3632_v52 = vadd.f32 %v3628_v3, %v3608_v47  ;;  %v3626_v39 = vmul.f32 %v3622_v51, %v3600_v5  ;;  %v3625_v63 = vmul.f32 %v3621_v17, %v3611_v19  ;;  %v3619_v4 = vmul.f32 0.044715, %v3603_v34 }
 0x93d   :  { %v3615_v25 = vmul.f32 0.5, %v3603_v34 }
 0x93e   :  { %v3636_v28 = vmul.f32 0.7978846, %v3632_v52  ;;  %v3630_v55 = vadd.f32 %v3626_v39, %v3600_v5  ;;  %v3629_v48 = vmul.f32 %v3625_v63, %v3611_v19  ;;  %v3623_v30 = vmul.f32 %v3619_v4, %v3603_v34 }
 0x940   :  { %v3634_v56 = vmul.f32 0.7978846, %v3630_v55  ;;  %v3633_v16 = vadd.f32 %v3629_v48, %v3611_v19  ;;  %v3627_v20 = vmul.f32 %v3623_v30, %v3603_v34  ;;  %4141 = vtanh.f32 %v3636_v28 }
 0x942   :  { %v3637_v35 = vmul.f32 0.7978846, %v3633_v16  ;;  %4143 = vtanh.f32 %v3634_v56  ;;  %v3631_v24 = vadd.f32 %v3627_v20, %v3603_v34 }
 0x944   :  { %4145 = vtanh.f32 %v3637_v35  ;;  %v3635_v40 = vmul.f32 0.7978846, %v3631_v24 }
 0x946   :  { %4147 = vtanh.f32 %v3635_v40 }
 0x94d   :  { %v4142_v9 = vpop.eup %4141 }
 0x94e   :  { %v3644_v62 = vadd.f32 1.0, %v4142_v9 }
 0x94f   :  { %v4144_v43 = vpop.eup %4143 }
 0x950   :  { %v3642_v32 = vadd.f32 1.0, %v4144_v43  ;;  %v3648_v2 = vmul.f32 %v3644_v62, %v3616_v36 }
 0x951   :  { %v4146_v6 = vpop.eup %4145 }
 0x952   :  { %v3645_v50 = vadd.f32 1.0, %v4146_v6  ;;  %v3646_v54 = vmul.f32 %v3642_v32, %v3614_v11 }
 0x953   :  { %v4148_v42 = vpop.eup %4147 }
 0x954   :  { %v3643_v60 = vadd.f32 1.0, %v4148_v42  ;;  %v3649_v61 = vmul.f32 %v3645_v50, %v3617_v31 }
 0x956   :  { %v3647_v8 = vmul.f32 %v3643_v60, %v3615_v25  ;;  %v3651_v58 = vpack.c.bf16 %v3649_v61, %v3648_v2 }
 0x958   :  { %v3650_v0 = vpack.c.bf16 %v3647_v8, %v3646_v54 }
 0x95a   :  { %4026 = vmatprep.mubr.msk.bf16.mxu1 %vm3691_vm6, %v3650_v0 }
 0x95b   :  { %4027 = vmatmul.mubr.msk.bf16.vlgmr.msra.gmra.mxu1 %vm3691_vm6, %v3651_v58 }
 0xa1b   :  { %v4028_v12 = vpop.f32.mrf.mxu1 }
 0xa1c   :  { %v3741_v57 = vadd.f32 %v4028_v12, %v3841_v14 }
 0xa1d   :  { %v3732_v29 = vpop.f32.mrf.mxu1 }
 0xa1e   :  { %v3749_v41 = vadd.f32 %v3741_v57, %v5163_v33  ;;  %v3733_v45 = vadd.f32 %v3841_v14, %v3732_v29 }
 0xa1f   :  { %v4029_v7 = vpop.f32.mrf.mxu1 }
 0xa20   :  { %3753 = vst.msk [vmem:[#allocation11 + $0x10] sm:$0xff] %vm112_vm0, %v3749_v41  ;;  %v3747_v15 = vadd.f32 %v3733_v45, %v5158_v18  ;;  %v3744_v38 = vadd.f32 %v4029_v7, %v3841_v14 }
 0xa21   :  { %v3735_v59 = vpop.f32.mrf.mxu1 }
 0xa22   :  { %3751 = vst.msk [vmem:[#allocation11] sm:$0xff] %vm112_vm0, %v3747_v15  ;;  %v3750_v37 = vadd.f32 %v3744_v38, %v5175_v27  ;;  %v3736_v21 = vadd.f32 %v3841_v14, %v3735_v59 }
 0xa24   :  { %3754 = vst.msk [vmem:[#allocation11 + $0x18] sm:$0xff] %vm112_vm0, %v3750_v37  ;;  %v3748_v44 = vadd.f32 %v3736_v21, %v5170_v46 }
 0xa26   :  { %3752 = vst.msk [vmem:[#allocation11 + $0x8] sm:$0xff] %vm112_vm0, %v3748_v44 }
 0xa27   :  { %4264 = shalt.err (!%p4261_p1)
}
 0xa28   :  { %s4301_s30 = smov 128  }
 0xa29   :  { %3766 = dma.vmem_to_hbm [thread:$0]  %s3761_s2, 512, %s5233_s13, [#allocation4], %s4301_s30, %s4301_s30, %s4298_s5  }
 0xa2a   :  { %4279 = dma.done.wait [#allocation4], 512  }
 0xa2b   :  { %4280 = vsyncadd [#allocation4], 4294966784 }
 0xa2c   :  { %3770 = vsyncpa [#allocation3], 1 }
 0xa2d   :  { %3771 = vsyncpa [#allocation6], 1 }
 0xa2e   :  { %3772 = vsyncpa [#allocation9], 1 }
 0xa2f   :  { %3773 = vsyncpa [#allocation4], 1 }

</bundles_post_ra>
